<compile_context>
chip_gen: v6e
topology: v6e:2x2x1
jax: 0.10.0
libtpu: 0.0.40
codegen_flags: <defaults>
</compile_context>

<pallas_src>
import numpy as np
import jax
import jax.numpy as jnp
from jax import lax
from jax.experimental import pallas as pl
from jax.experimental.pallas import tpu as pltpu

SMEM = pltpu.MemorySpace.SMEM


# ----------------------------- kernel helpers ------------------------------

def _sigmoid(x):
    return 1.0 / (1.0 + jnp.exp(-x))


def _softplus_clamped(z):
    # Numerically stable softplus, clamped at 100 to mirror torch BCELoss's
    # per-log-term clamp at -100.
    return jnp.minimum(jnp.maximum(z, 0.0) + jnp.log1p(jnp.exp(-jnp.abs(z))), 100.0)


def _grid_and_anchor_planes(pid, tile_m, P, in_w, A, anchor_w, anchor_h):
    """In-kernel gx/gy/anchor planes from iota + compile-time constants."""
    inv_w = 1.0 / float(in_w)
    inv_a = 1.0 / float(A)

    col2 = lax.broadcasted_iota(jnp.int32, (tile_m, P), 1).astype(jnp.float32)
    col = col2[:, None, :]                                    # (tm, 1, P)
    gy = jnp.floor((col + 0.5) * inv_w)
    gx = col - gy * float(in_w)

    row2 = lax.broadcasted_iota(jnp.int32, (tile_m, P), 0).astype(jnp.float32)
    rowf = (pid * tile_m).astype(jnp.float32) + row2[:, None, :]   # (tm, 1, P)
    # rows are (batch, anchor) flattened -> anchor index = row % A (float mod)
    aidx = rowf - jnp.floor((rowf + 0.5) * inv_a) * float(A)
    aw = jnp.zeros((tile_m, 1, P), jnp.float32)
    ah = jnp.zeros((tile_m, 1, P), jnp.float32)
    for a in range(A):
        sel = aidx == float(a)
        aw = jnp.where(sel, anchor_w[a], aw)
        ah = jnp.where(sel, anchor_h[a], ah)
    return gx, gy, aw, ah


def _make_loss_kernel(*, tile_m, P, in_w, A, anchor_w, anchor_h, C,
                      n_conf, lam_iou, lam_conf, lam_cls):
    inv_nconf = 1.0 / float(n_conf)

    def kernel(pred_ref, tgt_ref, out_ref, acc_ref):
        pid = pl.program_id(0)

        @pl.when(pid == 0)
        def _init():
            for j in range(5):
                acc_ref[j] = jnp.float32(0.0)

        pv = pred_ref[...]                    # (tm, 5+C, P)
        tv = tgt_ref[...]                     # (tm, 6+C, P)

        px, py = pv[:, 0:1, :], pv[:, 1:2, :]
        pw, ph = pv[:, 2:3, :], pv[:, 3:4, :]
        pconf = pv[:, 4:5, :]
        pcls = pv[:, 5:, :]                   # (tm, C, P)

        m, nm = tv[:, 0:1, :], tv[:, 1:2, :]
        kx, ky = tv[:, 2:3, :], tv[:, 3:4, :]
        kw, kh = tv[:, 4:5, :], tv[:, 5:6, :]
        tcls = tv[:, 6:, :]                   # (tm, C, P)

        gx, gy, aw, ah = _grid_and_anchor_planes(
            pid, tile_m, P, in_w, A, anchor_w, anchor_h)

        # decoded predicted boxes (grid units, center xywh)
        hx = _sigmoid(px) + gx
        hy = _sigmoid(py) + gy
        hw = jnp.exp(pw) * aw
        hh = jnp.exp(ph) * ah

        # TODO(synk): bbox_xy_iou is a library helper not shown in the module;
        # implemented as the standard elementwise center-format (x,y,w,h) IoU.
        b1x1, b1x2 = hx - hw * 0.5, hx + hw * 0.5
        b1y1, b1y2 = hy - hh * 0.5, hy + hh * 0.5
        b2x1, b2x2 = kx - kw * 0.5, kx + kw * 0.5
        b2y1, b2y2 = ky - kh * 0.5, ky + kh * 0.5
        iw = jnp.maximum(jnp.minimum(b1x2, b2x2) - jnp.maximum(b1x1, b2x1), 0.0)
        ih = jnp.maximum(jnp.minimum(b1y2, b2y2) - jnp.maximum(b1y1, b2y1), 0.0)
        inter = iw * ih
        union = hw * hh + kw * kh - inter + 1e-16
        iou = inter / union

        # fused single-pass partial reductions (logits-space BCE)
        p_iou = jnp.sum((1.0 - iou) * m)
        p_conf_pos = jnp.sum(m * _softplus_clamped(-pconf))
        p_conf_neg = jnp.sum(nm * _softplus_clamped(pconf))
        p_cls = jnp.sum(m * _softplus_clamped((1.0 - 2.0 * tcls) * pcls))
        p_m = jnp.sum(m)

        acc_ref[0] = acc_ref[0] + p_iou
        acc_ref[1] = acc_ref[1] + p_conf_pos
        acc_ref[2] = acc_ref[2] + p_conf_neg
        acc_ref[3] = acc_ref[3] + p_cls
        acc_ref[4] = acc_ref[4] + p_m

        @pl.when(pid == pl.num_programs(0) - 1)
        def _finalize():
            loss_iou = acc_ref[0]
            loss_conf = (acc_ref[1] + 0.5 * acc_ref[2]) * inv_nconf
            # TODO(synk): no guard for sum(mask)==0 (would give inf/NaN), which
            # mirrors torch's BCELoss over an empty masked_select.
            loss_cls = acc_ref[3] / (acc_ref[4] * float(C))
            out_ref[0] = (lam_iou * loss_iou + lam_conf * loss_conf
                          + lam_cls * loss_cls)
            out_ref[1] = loss_iou
            out_ref[2] = loss_conf
            out_ref[3] = loss_cls

    return kernel


def _make_infer_kernel(*, tile_m, P, in_w, A, anchor_w, anchor_h,
                       stride_w, stride_h):
    def kernel(pred_ref, bx_ref, by_ref, bw_ref, bh_ref, conf_ref, cls_ref):
        pid = pl.program_id(0)
        pv = pred_ref[...]                    # (tm, 5+C, P)
        px, py = pv[:, 0:1, :], pv[:, 1:2, :]
        pw, ph = pv[:, 2:3, :], pv[:, 3:4, :]
        pconf = pv[:, 4:5, :]
        pcls = pv[:, 5:, :]

        gx, gy, aw, ah = _grid_and_anchor_planes(
            pid, tile_m, P, in_w, A, anchor_w, anchor_h)

        bx_ref[...] = (_sigmoid(px) + gx) * stride_w
        by_ref[...] = (_sigmoid(py) + gy) * stride_h
        bw_ref[...] = jnp.exp(pw) * aw * stride_w
        bh_ref[...] = jnp.exp(ph) * ah * stride_h
        conf_ref[...] = _sigmoid(pconf)
        cls_ref[...] = _sigmoid(pcls)

    return kernel


# ------------------------------ numpy reference ----------------------------
# Torch-faithful math (sigmoid then clamped-log BCE) to validate the kernels.

def _np_sigmoid(x):
    return 1.0 / (1.0 + np.exp(-x))


def _np_bce(p, t):
    with np.errstate(divide="ignore"):
        logp = np.maximum(np.log(p), -100.0)
        log1mp = np.maximum(np.log1p(-p), -100.0)
    return -(t * logp + (1.0 - t) * log1mp)


def _np_grid_anchor(M, P, in_w, scaled_anchors):
    A = len(scaled_anchors)
    col = np.arange(P, dtype=np.float32)[None, :]
    gy = np.floor(col / in_w)
    gx = col - gy * in_w
    aidx = np.arange(M) % A
    aw = np.asarray([a[0] for a in scaled_anchors], np.float32)[aidx][:, None]
    ah = np.asarray([a[1] for a in scaled_anchors], np.float32)[aidx][:, None]
    return gx, gy, aw, ah


def _reference_loss_np(x_np, tgt_np, scaled_anchors, in_h, in_w, num_classes,
                       lam_iou, lam_conf, lam_cls):
    bs, ch, H, W = x_np.shape
    A = len(scaled_anchors)
    attrs = 5 + num_classes
    M, P = bs * A, H * W
    pr = np.asarray(x_np, np.float32).reshape(M, attrs, P)
    px, py, pw, ph, pconf = pr[:, 0], pr[:, 1], pr[:, 2], pr[:, 3], pr[:, 4]
    pcls = pr[:, 5:]
    tg = np.asarray(tgt_np, np.float32)
    m, nm = tg[:, 0], tg[:, 1]
    kx, ky, kw, kh = tg[:, 2], tg[:, 3], tg[:, 4], tg[:, 5]
    tcls = tg[:, 6:]

    gx, gy, aw, ah = _np_grid_anchor(M, P, in_w, scaled_anchors)

    hx = _np_sigmoid(px) + gx
    hy = _np_sigmoid(py) + gy
    hw = np.exp(pw) * aw
    hh = np.exp(ph) * ah
    conf = _np_sigmoid(pconf)
    cls_p = _np_sigmoid(pcls)

    b1x1, b1x2 = hx - hw * 0.5, hx + hw * 0.5
    b1y1, b1y2 = hy - hh * 0.5, hy + hh * 0.5
    b2x1, b2x2 = kx - kw * 0.5, kx + kw * 0.5
    b2y1, b2y2 = ky - kh * 0.5, ky + kh * 0.5
    iw = np.maximum(np.minimum(b1x2, b2x2) - np.maximum(b1x1, b2x1), 0.0)
    ih = np.maximum(np.minimum(b1y2, b2y2) - np.maximum(b1y1, b2y1), 0.0)
    inter = iw * ih
    union = hw * hh + kw * kh - inter + 1e-16
    iou = inter / union

    loss_iou = np.sum((1.0 - iou) * m)
    loss_conf = (np.mean(_np_bce(conf * m, m))
                 + 0.5 * np.mean(_np_bce(conf * nm, np.zeros_like(nm))))
    loss_cls = (np.sum(_np_bce(cls_p, tcls) * m[:, None, :])
                / (np.sum(m) * float(num_classes)))
    total = lam_iou * loss_iou + lam_conf * loss_conf + lam_cls * loss_cls
    return np.array([total, loss_iou, loss_conf, loss_cls], np.float32)


def _reference_infer_np(x_np, scaled_anchors, in_h, in_w, num_classes,
                        stride_w, stride_h):
    bs, ch, H, W = x_np.shape
    A = len(scaled_anchors)
    attrs = 5 + num_classes
    M, P = bs * A, H * W
    pr = np.asarray(x_np, np.float32).reshape(M, attrs, P)
    gx, gy, aw, ah = _np_grid_anchor(M, P, in_w, scaled_anchors)
    bx = (_np_sigmoid(pr[:, 0]) + gx) * stride_w
    by = (_np_sigmoid(pr[:, 1]) + gy) * stride_h
    bw = np.exp(pr[:, 2]) * aw * stride_w
    bh = np.exp(pr[:, 3]) * ah * stride_h
    conf = _np_sigmoid(pr[:, 4])
    clsp = _np_sigmoid(pr[:, 5:])                       # (M, C, P)
    out = np.concatenate(
        [bx[:, :, None], by[:, :, None], bw[:, :, None], bh[:, :, None],
         conf[:, :, None], np.transpose(clsp, (0, 2, 1))], axis=-1)
    return out.reshape(bs, A * P, attrs)


# --------------------------------- module ----------------------------------

class YoloLossPallas:
    def __init__(self, config, idx, tile_m=None):
        self.anchors = config["anchors"][idx]
        self.num_anchors = len(self.anchors)
        self.num_classes = config["classes"]
        self.bbox_attrs = 5 + self.num_classes
        self.img_size = (config["img_w"], config["img_h"])
        self.ignore_threshold = 0.5
        self.lambda_iou = 0.5
        self.lambda_conf = 1.0
        self.lambda_cls = 1.0
        self.tile_m = tile_m   # optional override (testing / tuning)

    # ---- host-side glue -----------------------------------------------

    def _choose_tile_m(self, M, P, n_chan):
        if self.tile_m is not None:
            return max(1, min(int(self.tile_m), M))
        # 8 MiB input-tile budget, double-buffered f32 rows of n_chan planes.
        budget = 8 << 20
        per_row = 8 * P * n_chan
        return int(max(1, min(M, budget // max(per_row, 1))))

    def _decode_packed_np(self, target, anchors, in_w, in_h):
        # TODO(synk): the per-target sequential scatter of `_decode` is
        # data-dependent host-side indexing with no clean Pallas equivalent;
        # kept as numpy glue.  tx/ty/tw/th/tconf are unused by the loss.
        # Packed channel layout: [mask, noobj, kx, ky, kw, kh, tcls(0..C-1)].
        bs = target.shape[0]
        A, C = self.num_anchors, self.num_classes
        nch = 6 + C
        tgt = np.zeros((bs, A, nch, in_h, in_w), np.float32)
        tgt[:, :, 1] = 1.0                      # noobj mask starts at 1
        anc = np.asarray(anchors, np.float32)   # (A, 2)
        for b in range(bs):
            for t in range(target.shape[1]):
                if float(target[b, t].sum()) == 0:
                    continue
                gx = float(target[b, t, 1]) * in_w
                gy = float(target[b, t, 2]) * in_h
                gw = float(target[b, t, 3]) * in_w
                gh = float(target[b, t, 4]) * in_h
                gi, gj = int(gx), int(gy)
                # TODO(synk): bbox_iou helper not shown; anchor wh-IoU (equivalent).
                inter = np.minimum(gw, anc[:, 0]) * np.minimum(gh, anc[:, 1])
                union = gw * gh + anc[:, 0] * anc[:, 1] - inter + 1e-16
                anch_ious = inter / union
                tgt[b, anch_ious > self.ignore_threshold, 1, gj, gi] = 0.0
                best_n = int(np.argmax(anch_ious))
                tgt[b, best_n, 0, gj, gi] = 1.0
                tgt[b, best_n, 2, gj, gi] = gx
                tgt[b, best_n, 3, gj, gi] = gy
                tgt[b, best_n, 4, gj, gi] = gw
                tgt[b, best_n, 5, gj, gi] = gh
                tgt[b, best_n, 6 + int(target[b, t, 0]), gj, gi] = 1.0
        return tgt.reshape(bs * A, nch, in_h * in_w)

    # ---- forward --------------------------------------------------------

    def forward(self, x, targets=None):
        x = jnp.asarray(x, jnp.float32)
        bs, _, in_h, in_w = x.shape
        A, attrs, C = self.num_anchors, self.bbox_attrs, self.num_classes
        stride_h = self.img_size[1] / in_h
        stride_w = self.img_size[0] / in_w
        scaled_anchors = [(a_w / stride_w, a_h / stride_h)
                          for a_w, a_h in self.anchors]
        anchor_w = [float(a[0]) for a in scaled_anchors]
        anchor_h = [float(a[1]) for a in scaled_anchors]

        M, P = bs * A, in_h * in_w
        # On-device reshape (no host round trip, no per-plane copies).
        pred_r = x.reshape(M, attrs, P)

        if targets is not None:
            tgt_np = self._decode_packed_np(np.asarray(targets, np.float32),
                                            scaled_anchors, in_w, in_h)
            n_chan = attrs + 6 + C
            tm = self._choose_tile_m(M, P, n_chan)
            n_tiles = -(-M // tm)
            Mp = n_tiles * tm
            pred_p = pred_r
            tgt_p = tgt_np
            if Mp > M:
                # zero-padded rows have mask==noobj==0 -> contribute nothing;
                # mean denominators below use the true (unpadded) counts.
                pred_p = jnp.concatenate(
                    [pred_r, jnp.zeros((Mp - M, attrs, P), jnp.float32)], axis=0)
                tgt_p = np.concatenate(
                    [tgt_np, np.zeros((Mp - M, 6 + C, P), np.float32)], axis=0)

            kernel = _make_loss_kernel(
                tile_m=tm, P=P, in_w=in_w, A=A,
                anchor_w=anchor_w, anchor_h=anchor_h, C=C,
                n_conf=M * P,
                lam_iou=self.lambda_iou, lam_conf=self.lambda_conf,
                lam_cls=self.lambda_cls)

            cost = pl.CostEstimate(
                flops=int(Mp * P * (60 + 8 * C)),
                transcendentals=int(Mp * P * (6 + 2 * C)),
                bytes_accessed=int(4 * Mp * P * n_chan + 16),
            )
            out = pl.pallas_call(
                kernel,
                out_shape=jax.ShapeDtypeStruct((4,), jnp.float32),
                grid_spec=pltpu.PrefetchScalarGridSpec(
                    num_scalar_prefetch=0,
                    grid=(n_tiles,),
                    in_specs=[
                        pl.BlockSpec((tm, attrs, P), lambda i: (i, 0, 0)),
                        pl.BlockSpec((tm, 6 + C, P), lambda i: (i, 0, 0)),
                    ],
                    out_specs=pl.BlockSpec(memory_space=SMEM),
                    scratch_shapes=[pltpu.SMEM((8,), jnp.float32)],
                ),
                compiler_params=pltpu.CompilerParams(
                    dimension_semantics=("arbitrary",),
                    vmem_limit_bytes=32 * 1024 * 1024,
                ),
                cost_estimate=cost,
            )(pred_p, jnp.asarray(tgt_p))
            # out = [loss, loss_iou, loss_conf, loss_cls]
            return out

        # ---- inference branch (targets is None) -------------------------
        n_chan = 2 * attrs
        tm = self._choose_tile_m(M, P, n_chan)
        n_tiles = -(-M // tm)
        Mp = n_tiles * tm
        pred_p = pred_r
        if Mp > M:
            pred_p = jnp.concatenate(
                [pred_r, jnp.zeros((Mp - M, attrs, P), jnp.float32)], axis=0)

        kernel = _make_infer_kernel(
            tile_m=tm, P=P, in_w=in_w, A=A,
            anchor_w=anchor_w, anchor_h=anchor_h,
            stride_w=stride_w, stride_h=stride_h)

        plane = jax.ShapeDtypeStruct((Mp, 1, P), jnp.float32)
        cost = pl.CostEstimate(
            flops=int(Mp * P * (20 + 4 * C)),
            transcendentals=int(Mp * P * (4 + C)),
            bytes_accessed=int(4 * Mp * P * n_chan),
        )
        outs = pl.pallas_call(
            kernel,
            out_shape=(plane,) * 5
                      + (jax.ShapeDtypeStruct((Mp, C, P), jnp.float32),),
            grid_spec=pltpu.PrefetchScalarGridSpec(
                num_scalar_prefetch=0,
                grid=(n_tiles,),
                in_specs=[pl.BlockSpec((tm, attrs, P), lambda i: (i, 0, 0))],
                out_specs=tuple([pl.BlockSpec((tm, 1, P), lambda i: (i, 0, 0))] * 5
                                + [pl.BlockSpec((tm, C, P), lambda i: (i, 0, 0))]),
            ),
            compiler_params=pltpu.CompilerParams(
                dimension_semantics=("parallel",),
                vmem_limit_bytes=32 * 1024 * 1024,
            ),
            cost_estimate=cost,
        )(pred_p)
        bx, by, bw, bh, conf, clsp = outs
        # final assembly / layout change is plain XLA in the wrapper
        boxes = jnp.stack([bx[:M, 0], by[:M, 0], bw[:M, 0], bh[:M, 0]], axis=-1)
        conf = conf[:M, 0][..., None]
        clsp = jnp.transpose(clsp[:M], (0, 2, 1))
        out = jnp.concatenate([boxes, conf, clsp], axis=-1)    # (M, P, 5+C)
        return out.reshape(bs, A * P, 5 + C)


# ----------------------------------- main -----------------------------------

if __name__ == "__main__":
    config = {
        "anchors": [[(10, 13), (16, 30), (33, 23)]],
        "classes": 4,
        "img_w": 128,
        "img_h": 128,
    }
    # tile_m=2 forces a multi-step grid (M = bs*A = 6 -> 3 grid steps) so the
    # accumulate/finalize reduction path is exercised even at toy shapes.
    module = YoloLossPallas(config, idx=0, tile_m=2)

    bs, in_h, in_w = 2, 16, 16
    ch = module.num_anchors * module.bbox_attrs  # 3 * 9 = 27
    key = jax.random.PRNGKey(0)
    x = jax.random.normal(key, (bs, ch, in_h, in_w), dtype=jnp.float32)

    # deterministic targets: [class_id, x, y, w, h] normalized to (0, 1)
    targets = np.zeros((bs, 3, 5), np.float32)
    targets[0, 0] = [1, 0.30, 0.40, 0.20, 0.25]
    targets[0, 1] = [3, 0.70, 0.60, 0.10, 0.15]
    targets[1, 0] = [0, 0.55, 0.25, 0.30, 0.35]

    # training branch (loss) and inference branch (decoded detections)
    loss_vec = jax.block_until_ready(module.forward(x, targets))
    det = jax.block_until_ready(module.forward(x, None))

    # correctness: independent numpy reference using torch-style sigmoid + clamped BCE
    stride_h = config["img_h"] / in_h
    stride_w = config["img_w"] / in_w
    scaled_anchors = [(a_w / stride_w, a_h / stride_h) for a_w, a_h in module.anchors]
    tgt_np = module._decode_packed_np(targets, scaled_anchors, in_w, in_h)
    ref_loss = _reference_loss_np(np.asarray(x), tgt_np, scaled_anchors, in_h, in_w,
                                  module.num_classes, module.lambda_iou,
                                  module.lambda_conf, module.lambda_cls)
    np.testing.assert_allclose(np.asarray(loss_vec), ref_loss, rtol=2e-3, atol=2e-3)

    ref_det = _reference_infer_np(np.asarray(x), scaled_anchors, in_h, in_w,
                                  module.num_classes, stride_w, stride_h)
    assert det.shape == (bs, module.num_anchors * in_h * in_w, 5 + module.num_classes)
    np.testing.assert_allclose(np.asarray(det), ref_det, rtol=2e-3, atol=2e-3)

    assert np.all(np.isfinite(np.asarray(det)))
    assert np.all(np.isfinite(np.asarray(loss_vec)))

    print("KERNEL_OK")
</pallas_src>

<mosaic_0001>
module attributes {stable_mosaic.version = 11 : i64} {
  func.func @kernel(%arg0: i32, %arg1: memref<2x9x256xf32, #tpu.memory_space<vmem>>, %arg2: memref<2x10x256xf32, #tpu.memory_space<vmem>>, %arg3: memref<4xf32, #tpu.memory_space<smem>>, %arg4: memref<8xf32, #tpu.memory_space<smem>>) attributes {dimension_semantics = [#tpu.dimension_semantics<arbitrary>], iteration_bounds = array<i64: 3>, scalar_prefetch = 0 : i64, scratch_operands = 1 : i64, tpu.core_type = #tpu.core_type<tc>, window_params = [{transform_indices = @transform_0, window_bounds = array<i64: 2, 9, 256>}, {transform_indices = @transform_1, window_bounds = array<i64: 2, 10, 256>}, {transform_indices = @transform_2, window_bounds = array<i64: 4>}]} {
    %c0_i32 = arith.constant 0 : i32
    %0 = arith.cmpi eq, %arg0, %c0_i32 : i32
    %1 = arith.extui %0 : i1 to i32
    %c0_i32_0 = arith.constant 0 : i32
    %2 = arith.cmpi ne, %1, %c0_i32_0 : i32
    scf.if %2 {
      %cst_65 = arith.constant 0.000000e+00 : f32
      %c0_66 = arith.constant 0 : index
      %208 = memref.load %arg4[%c0_66] : memref<8xf32, #tpu.memory_space<smem>>
      memref.store %cst_65, %arg4[%c0_66] : memref<8xf32, #tpu.memory_space<smem>>
      %cst_67 = arith.constant 0.000000e+00 : f32
      %c1_68 = arith.constant 1 : index
      %209 = memref.load %arg4[%c1_68] : memref<8xf32, #tpu.memory_space<smem>>
      memref.store %cst_67, %arg4[%c1_68] : memref<8xf32, #tpu.memory_space<smem>>
      %cst_69 = arith.constant 0.000000e+00 : f32
      %c2_70 = arith.constant 2 : index
      %210 = memref.load %arg4[%c2_70] : memref<8xf32, #tpu.memory_space<smem>>
      memref.store %cst_69, %arg4[%c2_70] : memref<8xf32, #tpu.memory_space<smem>>
      %cst_71 = arith.constant 0.000000e+00 : f32
      %c3_72 = arith.constant 3 : index
      %211 = memref.load %arg4[%c3_72] : memref<8xf32, #tpu.memory_space<smem>>
      memref.store %cst_71, %arg4[%c3_72] : memref<8xf32, #tpu.memory_space<smem>>
      %cst_73 = arith.constant 0.000000e+00 : f32
      %c4_74 = arith.constant 4 : index
      %212 = memref.load %arg4[%c4_74] : memref<8xf32, #tpu.memory_space<smem>>
      memref.store %cst_73, %arg4[%c4_74] : memref<8xf32, #tpu.memory_space<smem>>
    } else {
    }
    %c0 = arith.constant 0 : index
    %c0_1 = arith.constant 0 : index
    %c0_2 = arith.constant 0 : index
    %3 = vector.load %arg1[%c0, %c0_1, %c0_2] : memref<2x9x256xf32, #tpu.memory_space<vmem>>, vector<2x9x256xf32>
    %c0_3 = arith.constant 0 : index
    %c0_4 = arith.constant 0 : index
    %c0_5 = arith.constant 0 : index
    %4 = vector.load %arg2[%c0_3, %c0_4, %c0_5] : memref<2x10x256xf32, #tpu.memory_space<vmem>>, vector<2x10x256xf32>
    %5 = vector.extract_strided_slice %3 {offsets = [0, 0, 0], sizes = [2, 1, 256], strides = [1, 1, 1]} : vector<2x9x256xf32> to vector<2x1x256xf32>
    %6 = vector.extract_strided_slice %3 {offsets = [0, 1, 0], sizes = [2, 1, 256], strides = [1, 1, 1]} : vector<2x9x256xf32> to vector<2x1x256xf32>
    %7 = vector.extract_strided_slice %3 {offsets = [0, 2, 0], sizes = [2, 1, 256], strides = [1, 1, 1]} : vector<2x9x256xf32> to vector<2x1x256xf32>
    %8 = vector.extract_strided_slice %3 {offsets = [0, 3, 0], sizes = [2, 1, 256], strides = [1, 1, 1]} : vector<2x9x256xf32> to vector<2x1x256xf32>
    %9 = vector.extract_strided_slice %3 {offsets = [0, 4, 0], sizes = [2, 1, 256], strides = [1, 1, 1]} : vector<2x9x256xf32> to vector<2x1x256xf32>
    %10 = vector.extract_strided_slice %3 {offsets = [0, 5, 0], sizes = [2, 4, 256], strides = [1, 1, 1]} : vector<2x9x256xf32> to vector<2x4x256xf32>
    %11 = vector.extract_strided_slice %4 {offsets = [0, 0, 0], sizes = [2, 1, 256], strides = [1, 1, 1]} : vector<2x10x256xf32> to vector<2x1x256xf32>
    %12 = vector.extract_strided_slice %4 {offsets = [0, 1, 0], sizes = [2, 1, 256], strides = [1, 1, 1]} : vector<2x10x256xf32> to vector<2x1x256xf32>
    %13 = vector.extract_strided_slice %4 {offsets = [0, 2, 0], sizes = [2, 1, 256], strides = [1, 1, 1]} : vector<2x10x256xf32> to vector<2x1x256xf32>
    %14 = vector.extract_strided_slice %4 {offsets = [0, 3, 0], sizes = [2, 1, 256], strides = [1, 1, 1]} : vector<2x10x256xf32> to vector<2x1x256xf32>
    %15 = vector.extract_strided_slice %4 {offsets = [0, 4, 0], sizes = [2, 1, 256], strides = [1, 1, 1]} : vector<2x10x256xf32> to vector<2x1x256xf32>
    %16 = vector.extract_strided_slice %4 {offsets = [0, 5, 0], sizes = [2, 1, 256], strides = [1, 1, 1]} : vector<2x10x256xf32> to vector<2x1x256xf32>
    %17 = vector.extract_strided_slice %4 {offsets = [0, 6, 0], sizes = [2, 4, 256], strides = [1, 1, 1]} : vector<2x10x256xf32> to vector<2x4x256xf32>
    %18 = tpu.iota {dimensions = array<i32: 1>} : vector<2x256xi32>
    %19 = arith.sitofp %18 : vector<2x256xi32> to vector<2x256xf32>
    %20 = vector.shape_cast %19 : vector<2x256xf32> to vector<2x1x256xf32>
    %cst = arith.constant 5.000000e-01 : f32
    %21 = vector.broadcast %cst : f32 to vector<2x1x256xf32>
    %22 = arith.addf %20, %21 : vector<2x1x256xf32>
    %cst_6 = arith.constant 6.250000e-02 : f32
    %23 = vector.broadcast %cst_6 : f32 to vector<2x1x256xf32>
    %24 = arith.mulf %22, %23 : vector<2x1x256xf32>
    %25 = math.floor %24 : vector<2x1x256xf32>
    %cst_7 = arith.constant 1.600000e+01 : f32
    %26 = vector.broadcast %cst_7 : f32 to vector<2x1x256xf32>
    %27 = arith.mulf %25, %26 : vector<2x1x256xf32>
    %28 = arith.subf %20, %27 : vector<2x1x256xf32>
    %29 = tpu.iota {dimensions = array<i32: 0>} : vector<2x256xi32>
    %30 = arith.sitofp %29 : vector<2x256xi32> to vector<2x256xf32>
    %c2_i32 = arith.constant 2 : i32
    %31 = arith.muli %arg0, %c2_i32 : i32
    %32 = arith.sitofp %31 : i32 to f32
    %33 = vector.shape_cast %30 : vector<2x256xf32> to vector<2x1x256xf32>
    %34 = vector.broadcast %32 : f32 to vector<2x1x256xf32>
    %35 = arith.addf %34, %33 : vector<2x1x256xf32>
    %cst_8 = arith.constant 5.000000e-01 : f32
    %36 = vector.broadcast %cst_8 : f32 to vector<2x1x256xf32>
    %37 = arith.addf %35, %36 : vector<2x1x256xf32>
    %cst_9 = arith.constant 0.333333343 : f32
    %38 = vector.broadcast %cst_9 : f32 to vector<2x1x256xf32>
    %39 = arith.mulf %37, %38 : vector<2x1x256xf32>
    %40 = math.floor %39 : vector<2x1x256xf32>
    %cst_10 = arith.constant 3.000000e+00 : f32
    %41 = vector.broadcast %cst_10 : f32 to vector<2x1x256xf32>
    %42 = arith.mulf %40, %41 : vector<2x1x256xf32>
    %43 = arith.subf %35, %42 : vector<2x1x256xf32>
    %cst_11 = arith.constant 0.000000e+00 : f32
    %44 = vector.broadcast %cst_11 : f32 to vector<2x1x256xf32>
    %cst_12 = arith.constant 0.000000e+00 : f32
    %45 = vector.broadcast %cst_12 : f32 to vector<2x1x256xf32>
    %cst_13 = arith.constant 0.000000e+00 : f32
    %46 = vector.broadcast %cst_13 : f32 to vector<2x1x256xf32>
    %47 = arith.cmpf oeq, %43, %46 : vector<2x1x256xf32>
    %cst_14 = arith.constant 1.250000e+00 : f32
    %48 = vector.broadcast %cst_14 : f32 to vector<2x1x256xf32>
    %49 = arith.select %47, %48, %44 : vector<2x1x256xi1>, vector<2x1x256xf32>
    %cst_15 = arith.constant 1.625000e+00 : f32
    %50 = vector.broadcast %cst_15 : f32 to vector<2x1x256xf32>
    %51 = arith.select %47, %50, %45 : vector<2x1x256xi1>, vector<2x1x256xf32>
    %cst_16 = arith.constant 1.000000e+00 : f32
    %52 = vector.broadcast %cst_16 : f32 to vector<2x1x256xf32>
    %53 = arith.cmpf oeq, %43, %52 : vector<2x1x256xf32>
    %cst_17 = arith.constant 2.000000e+00 : f32
    %54 = vector.broadcast %cst_17 : f32 to vector<2x1x256xf32>
    %55 = arith.select %53, %54, %49 : vector<2x1x256xi1>, vector<2x1x256xf32>
    %cst_18 = arith.constant 3.750000e+00 : f32
    %56 = vector.broadcast %cst_18 : f32 to vector<2x1x256xf32>
    %57 = arith.select %53, %56, %51 : vector<2x1x256xi1>, vector<2x1x256xf32>
    %cst_19 = arith.constant 2.000000e+00 : f32
    %58 = vector.broadcast %cst_19 : f32 to vector<2x1x256xf32>
    %59 = arith.cmpf oeq, %43, %58 : vector<2x1x256xf32>
    %cst_20 = arith.constant 4.125000e+00 : f32
    %60 = vector.broadcast %cst_20 : f32 to vector<2x1x256xf32>
    %61 = arith.select %59, %60, %55 : vector<2x1x256xi1>, vector<2x1x256xf32>
    %cst_21 = arith.constant 2.875000e+00 : f32
    %62 = vector.broadcast %cst_21 : f32 to vector<2x1x256xf32>
    %63 = arith.select %59, %62, %57 : vector<2x1x256xi1>, vector<2x1x256xf32>
    %cst_22 = arith.constant 0.000000e+00 : f32
    %64 = vector.broadcast %cst_22 : f32 to vector<2x1x256xf32>
    %65 = arith.subf %64, %5 : vector<2x1x256xf32>
    %66 = math.exp %65 : vector<2x1x256xf32>
    %cst_23 = arith.constant 1.000000e+00 : f32
    %67 = vector.broadcast %cst_23 : f32 to vector<2x1x256xf32>
    %68 = arith.addf %67, %66 : vector<2x1x256xf32>
    %cst_24 = arith.constant 1.000000e+00 : f32
    %69 = vector.broadcast %cst_24 : f32 to vector<2x1x256xf32>
    %70 = arith.divf %69, %68 : vector<2x1x256xf32>
    %71 = arith.addf %70, %28 : vector<2x1x256xf32>
    %cst_25 = arith.constant 0.000000e+00 : f32
    %72 = vector.broadcast %cst_25 : f32 to vector<2x1x256xf32>
    %73 = arith.subf %72, %6 : vector<2x1x256xf32>
    %74 = math.exp %73 : vector<2x1x256xf32>
    %cst_26 = arith.constant 1.000000e+00 : f32
    %75 = vector.broadcast %cst_26 : f32 to vector<2x1x256xf32>
    %76 = arith.addf %75, %74 : vector<2x1x256xf32>
    %cst_27 = arith.constant 1.000000e+00 : f32
    %77 = vector.broadcast %cst_27 : f32 to vector<2x1x256xf32>
    %78 = arith.divf %77, %76 : vector<2x1x256xf32>
    %79 = arith.addf %78, %25 : vector<2x1x256xf32>
    %80 = math.exp %7 : vector<2x1x256xf32>
    %81 = arith.mulf %80, %61 : vector<2x1x256xf32>
    %82 = math.exp %8 : vector<2x1x256xf32>
    %83 = arith.mulf %82, %63 : vector<2x1x256xf32>
    %cst_28 = arith.constant 5.000000e-01 : f32
    %84 = vector.broadcast %cst_28 : f32 to vector<2x1x256xf32>
    %85 = arith.mulf %81, %84 : vector<2x1x256xf32>
    %86 = arith.subf %71, %85 : vector<2x1x256xf32>
    %cst_29 = arith.constant 5.000000e-01 : f32
    %87 = vector.broadcast %cst_29 : f32 to vector<2x1x256xf32>
    %88 = arith.mulf %81, %87 : vector<2x1x256xf32>
    %89 = arith.addf %71, %88 : vector<2x1x256xf32>
    %cst_30 = arith.constant 5.000000e-01 : f32
    %90 = vector.broadcast %cst_30 : f32 to vector<2x1x256xf32>
    %91 = arith.mulf %83, %90 : vector<2x1x256xf32>
    %92 = arith.subf %79, %91 : vector<2x1x256xf32>
    %cst_31 = arith.constant 5.000000e-01 : f32
    %93 = vector.broadcast %cst_31 : f32 to vector<2x1x256xf32>
    %94 = arith.mulf %83, %93 : vector<2x1x256xf32>
    %95 = arith.addf %79, %94 : vector<2x1x256xf32>
    %cst_32 = arith.constant 5.000000e-01 : f32
    %96 = vector.broadcast %cst_32 : f32 to vector<2x1x256xf32>
    %97 = arith.mulf %15, %96 : vector<2x1x256xf32>
    %98 = arith.subf %13, %97 : vector<2x1x256xf32>
    %cst_33 = arith.constant 5.000000e-01 : f32
    %99 = vector.broadcast %cst_33 : f32 to vector<2x1x256xf32>
    %100 = arith.mulf %15, %99 : vector<2x1x256xf32>
    %101 = arith.addf %13, %100 : vector<2x1x256xf32>
    %cst_34 = arith.constant 5.000000e-01 : f32
    %102 = vector.broadcast %cst_34 : f32 to vector<2x1x256xf32>
    %103 = arith.mulf %16, %102 : vector<2x1x256xf32>
    %104 = arith.subf %14, %103 : vector<2x1x256xf32>
    %cst_35 = arith.constant 5.000000e-01 : f32
    %105 = vector.broadcast %cst_35 : f32 to vector<2x1x256xf32>
    %106 = arith.mulf %16, %105 : vector<2x1x256xf32>
    %107 = arith.addf %14, %106 : vector<2x1x256xf32>
    %108 = arith.minimumf %89, %101 : vector<2x1x256xf32>
    %109 = arith.maximumf %86, %98 : vector<2x1x256xf32>
    %110 = arith.subf %108, %109 : vector<2x1x256xf32>
    %cst_36 = arith.constant 0.000000e+00 : f32
    %111 = vector.broadcast %cst_36 : f32 to vector<2x1x256xf32>
    %112 = arith.maximumf %110, %111 : vector<2x1x256xf32>
    %113 = arith.minimumf %95, %107 : vector<2x1x256xf32>
    %114 = arith.maximumf %92, %104 : vector<2x1x256xf32>
    %115 = arith.subf %113, %114 : vector<2x1x256xf32>
    %cst_37 = arith.constant 0.000000e+00 : f32
    %116 = vector.broadcast %cst_37 : f32 to vector<2x1x256xf32>
    %117 = arith.maximumf %115, %116 : vector<2x1x256xf32>
    %118 = arith.mulf %112, %117 : vector<2x1x256xf32>
    %119 = arith.mulf %81, %83 : vector<2x1x256xf32>
    %120 = arith.mulf %15, %16 : vector<2x1x256xf32>
    %121 = arith.addf %119, %120 : vector<2x1x256xf32>
    %122 = arith.subf %121, %118 : vector<2x1x256xf32>
    %cst_38 = arith.constant 1.000000e-16 : f32
    %123 = vector.broadcast %cst_38 : f32 to vector<2x1x256xf32>
    %124 = arith.addf %122, %123 : vector<2x1x256xf32>
    %125 = arith.divf %118, %124 : vector<2x1x256xf32>
    %cst_39 = arith.constant 1.000000e+00 : f32
    %126 = vector.broadcast %cst_39 : f32 to vector<2x1x256xf32>
    %127 = arith.subf %126, %125 : vector<2x1x256xf32>
    %128 = arith.mulf %127, %11 : vector<2x1x256xf32>
    %129 = vector.shape_cast %128 : vector<2x1x256xf32> to vector<1x2x1x256xf32>
    %cst_40 = arith.constant dense<0.000000e+00> : vector<1xf32>
    %130 = vector.multi_reduction <add>, %129, %cst_40 [1, 2, 3] : vector<1x2x1x256xf32> to vector<1xf32>
    %131 = vector.shape_cast %130 : vector<1xf32> to vector<1x1x1x1xf32>
    %132 = vector.extract %131[0, 0, 0, 0] : f32 from vector<1x1x1x1xf32>
    %cst_41 = arith.constant 0.000000e+00 : f32
    %133 = vector.broadcast %cst_41 : f32 to vector<2x1x256xf32>
    %134 = arith.subf %133, %9 : vector<2x1x256xf32>
    %cst_42 = arith.constant 0.000000e+00 : f32
    %135 = vector.broadcast %cst_42 : f32 to vector<2x1x256xf32>
    %136 = arith.maximumf %134, %135 : vector<2x1x256xf32>
    %137 = math.absf %134 : vector<2x1x256xf32>
    %cst_43 = arith.constant 0.000000e+00 : f32
    %138 = vector.broadcast %cst_43 : f32 to vector<2x1x256xf32>
    %139 = arith.subf %138, %137 : vector<2x1x256xf32>
    %140 = math.exp %139 : vector<2x1x256xf32>
    %141 = math.log1p %140 : vector<2x1x256xf32>
    %142 = arith.addf %136, %141 : vector<2x1x256xf32>
    %cst_44 = arith.constant 1.000000e+02 : f32
    %143 = vector.broadcast %cst_44 : f32 to vector<2x1x256xf32>
    %144 = arith.minimumf %142, %143 : vector<2x1x256xf32>
    %145 = arith.mulf %11, %144 : vector<2x1x256xf32>
    %146 = vector.shape_cast %145 : vector<2x1x256xf32> to vector<1x2x1x256xf32>
    %cst_45 = arith.constant dense<0.000000e+00> : vector<1xf32>
    %147 = vector.multi_reduction <add>, %146, %cst_45 [1, 2, 3] : vector<1x2x1x256xf32> to vector<1xf32>
    %148 = vector.shape_cast %147 : vector<1xf32> to vector<1x1x1x1xf32>
    %149 = vector.extract %148[0, 0, 0, 0] : f32 from vector<1x1x1x1xf32>
    %cst_46 = arith.constant 0.000000e+00 : f32
    %150 = vector.broadcast %cst_46 : f32 to vector<2x1x256xf32>
    %151 = arith.maximumf %9, %150 : vector<2x1x256xf32>
    %152 = math.absf %9 : vector<2x1x256xf32>
    %cst_47 = arith.constant 0.000000e+00 : f32
    %153 = vector.broadcast %cst_47 : f32 to vector<2x1x256xf32>
    %154 = arith.subf %153, %152 : vector<2x1x256xf32>
    %155 = math.exp %154 : vector<2x1x256xf32>
    %156 = math.log1p %155 : vector<2x1x256xf32>
    %157 = arith.addf %151, %156 : vector<2x1x256xf32>
    %cst_48 = arith.constant 1.000000e+02 : f32
    %158 = vector.broadcast %cst_48 : f32 to vector<2x1x256xf32>
    %159 = arith.minimumf %157, %158 : vector<2x1x256xf32>
    %160 = arith.mulf %12, %159 : vector<2x1x256xf32>
    %161 = vector.shape_cast %160 : vector<2x1x256xf32> to vector<1x2x1x256xf32>
    %cst_49 = arith.constant dense<0.000000e+00> : vector<1xf32>
    %162 = vector.multi_reduction <add>, %161, %cst_49 [1, 2, 3] : vector<1x2x1x256xf32> to vector<1xf32>
    %163 = vector.shape_cast %162 : vector<1xf32> to vector<1x1x1x1xf32>
    %164 = vector.extract %163[0, 0, 0, 0] : f32 from vector<1x1x1x1xf32>
    %cst_50 = arith.constant 2.000000e+00 : f32
    %165 = vector.broadcast %cst_50 : f32 to vector<2x4x256xf32>
    %166 = arith.mulf %165, %17 : vector<2x4x256xf32>
    %cst_51 = arith.constant 1.000000e+00 : f32
    %167 = vector.broadcast %cst_51 : f32 to vector<2x4x256xf32>
    %168 = arith.subf %167, %166 : vector<2x4x256xf32>
    %169 = arith.mulf %168, %10 : vector<2x4x256xf32>
    %cst_52 = arith.constant 0.000000e+00 : f32
    %170 = vector.broadcast %cst_52 : f32 to vector<2x4x256xf32>
    %171 = arith.maximumf %169, %170 : vector<2x4x256xf32>
    %172 = math.absf %169 : vector<2x4x256xf32>
    %cst_53 = arith.constant 0.000000e+00 : f32
    %173 = vector.broadcast %cst_53 : f32 to vector<2x4x256xf32>
    %174 = arith.subf %173, %172 : vector<2x4x256xf32>
    %175 = math.exp %174 : vector<2x4x256xf32>
    %176 = math.log1p %175 : vector<2x4x256xf32>
    %177 = arith.addf %171, %176 : vector<2x4x256xf32>
    %cst_54 = arith.constant 1.000000e+02 : f32
    %178 = vector.broadcast %cst_54 : f32 to vector<2x4x256xf32>
    %179 = arith.minimumf %177, %178 : vector<2x4x256xf32>
    %180 = vector.broadcast %11 : vector<2x1x256xf32> to vector<2x4x256xf32>
    %181 = arith.mulf %180, %179 : vector<2x4x256xf32>
    %182 = vector.shape_cast %181 : vector<2x4x256xf32> to vector<1x2x4x256xf32>
    %cst_55 = arith.constant dense<0.000000e+00> : vector<1xf32>
    %183 = vector.multi_reduction <add>, %182, %cst_55 [1, 2, 3] : vector<1x2x4x256xf32> to vector<1xf32>
    %184 = vector.shape_cast %183 : vector<1xf32> to vector<1x1x1x1xf32>
    %185 = vector.extract %184[0, 0, 0, 0] : f32 from vector<1x1x1x1xf32>
    %186 = vector.shape_cast %11 : vector<2x1x256xf32> to vector<1x2x1x256xf32>
    %cst_56 = arith.constant dense<0.000000e+00> : vector<1xf32>
    %187 = vector.multi_reduction <add>, %186, %cst_56 [1, 2, 3] : vector<1x2x1x256xf32> to vector<1xf32>
    %188 = vector.shape_cast %187 : vector<1xf32> to vector<1x1x1x1xf32>
    %189 = vector.extract %188[0, 0, 0, 0] : f32 from vector<1x1x1x1xf32>
    %c0_57 = arith.constant 0 : index
    %190 = memref.load %arg4[%c0_57] : memref<8xf32, #tpu.memory_space<smem>>
    %191 = arith.addf %190, %132 : f32
    %c0_58 = arith.constant 0 : index
    %192 = memref.load %arg4[%c0_58] : memref<8xf32, #tpu.memory_space<smem>>
    memref.store %191, %arg4[%c0_58] : memref<8xf32, #tpu.memory_space<smem>>
    %c1 = arith.constant 1 : index
    %193 = memref.load %arg4[%c1] : memref<8xf32, #tpu.memory_space<smem>>
    %194 = arith.addf %193, %149 : f32
    %c1_59 = arith.constant 1 : index
    %195 = memref.load %arg4[%c1_59] : memref<8xf32, #tpu.memory_space<smem>>
    memref.store %194, %arg4[%c1_59] : memref<8xf32, #tpu.memory_space<smem>>
    %c2 = arith.constant 2 : index
    %196 = memref.load %arg4[%c2] : memref<8xf32, #tpu.memory_space<smem>>
    %197 = arith.addf %196, %164 : f32
    %c2_60 = arith.constant 2 : index
    %198 = memref.load %arg4[%c2_60] : memref<8xf32, #tpu.memory_space<smem>>
    memref.store %197, %arg4[%c2_60] : memref<8xf32, #tpu.memory_space<smem>>
    %c3 = arith.constant 3 : index
    %199 = memref.load %arg4[%c3] : memref<8xf32, #tpu.memory_space<smem>>
    %200 = arith.addf %199, %185 : f32
    %c3_61 = arith.constant 3 : index
    %201 = memref.load %arg4[%c3_61] : memref<8xf32, #tpu.memory_space<smem>>
    memref.store %200, %arg4[%c3_61] : memref<8xf32, #tpu.memory_space<smem>>
    %c4 = arith.constant 4 : index
    %202 = memref.load %arg4[%c4] : memref<8xf32, #tpu.memory_space<smem>>
    %203 = arith.addf %202, %189 : f32
    %c4_62 = arith.constant 4 : index
    %204 = memref.load %arg4[%c4_62] : memref<8xf32, #tpu.memory_space<smem>>
    memref.store %203, %arg4[%c4_62] : memref<8xf32, #tpu.memory_space<smem>>
    %c2_i32_63 = arith.constant 2 : i32
    %205 = arith.cmpi eq, %arg0, %c2_i32_63 : i32
    %206 = arith.extui %205 : i1 to i32
    %c0_i32_64 = arith.constant 0 : i32
    %207 = arith.cmpi ne, %206, %c0_i32_64 : i32
    scf.if %207 {
      %c0_65 = arith.constant 0 : index
      %208 = memref.load %arg4[%c0_65] : memref<8xf32, #tpu.memory_space<smem>>
      %c1_66 = arith.constant 1 : index
      %209 = memref.load %arg4[%c1_66] : memref<8xf32, #tpu.memory_space<smem>>
      %c2_67 = arith.constant 2 : index
      %210 = memref.load %arg4[%c2_67] : memref<8xf32, #tpu.memory_space<smem>>
      %cst_68 = arith.constant 5.000000e-01 : f32
      %211 = arith.mulf %cst_68, %210 : f32
      %212 = arith.addf %209, %211 : f32
      %cst_69 = arith.constant 6.51041686E-4 : f32
      %213 = arith.mulf %212, %cst_69 : f32
      %c3_70 = arith.constant 3 : index
      %214 = memref.load %arg4[%c3_70] : memref<8xf32, #tpu.memory_space<smem>>
      %c4_71 = arith.constant 4 : index
      %215 = memref.load %arg4[%c4_71] : memref<8xf32, #tpu.memory_space<smem>>
      %cst_72 = arith.constant 4.000000e+00 : f32
      %216 = arith.mulf %215, %cst_72 : f32
      %217 = arith.divf %214, %216 : f32
      %cst_73 = arith.constant 5.000000e-01 : f32
      %218 = arith.mulf %cst_73, %208 : f32
      %cst_74 = arith.constant 1.000000e+00 : f32
      %219 = arith.mulf %cst_74, %213 : f32
      %220 = arith.addf %218, %219 : f32
      %cst_75 = arith.constant 1.000000e+00 : f32
      %221 = arith.mulf %cst_75, %217 : f32
      %222 = arith.addf %220, %221 : f32
      %c0_76 = arith.constant 0 : index
      %223 = memref.load %arg3[%c0_76] : memref<4xf32, #tpu.memory_space<smem>>
      memref.store %222, %arg3[%c0_76] : memref<4xf32, #tpu.memory_space<smem>>
      %c1_77 = arith.constant 1 : index
      %224 = memref.load %arg3[%c1_77] : memref<4xf32, #tpu.memory_space<smem>>
      memref.store %208, %arg3[%c1_77] : memref<4xf32, #tpu.memory_space<smem>>
      %c2_78 = arith.constant 2 : index
      %225 = memref.load %arg3[%c2_78] : memref<4xf32, #tpu.memory_space<smem>>
      memref.store %213, %arg3[%c2_78] : memref<4xf32, #tpu.memory_space<smem>>
      %c3_79 = arith.constant 3 : index
      %226 = memref.load %arg3[%c3_79] : memref<4xf32, #tpu.memory_space<smem>>
      memref.store %217, %arg3[%c3_79] : memref<4xf32, #tpu.memory_space<smem>>
    } else {
    }
    return
  }
  func.func @transform_0(%arg0: i32) -> (i32, i32, i32) {
    %c0_i32 = arith.constant 0 : i32
    %c0_i32_0 = arith.constant 0 : i32
    %c0_i32_1 = arith.constant 0 : i32
    return %arg0, %c0_i32, %c0_i32_0 : i32, i32, i32
  }
  func.func @transform_1(%arg0: i32) -> (i32, i32, i32) {
    %c0_i32 = arith.constant 0 : i32
    %c0_i32_0 = arith.constant 0 : i32
    %c0_i32_1 = arith.constant 0 : i32
    return %arg0, %c0_i32, %c0_i32_0 : i32, i32, i32
  }
  func.func @transform_2(%arg0: i32) -> i32 {
    %c0_i32 = arith.constant 0 : i32
    %c0_i32_0 = arith.constant 0 : i32
    return %c0_i32 : i32
  }
}

</mosaic_0001>

<bundles_post_ra>
// kernel: tpu_custom_call.1
= control target key start
LH: loop header
LB: loop body
LE: loop exit
PB: predicated region body
PF: predicated region fallthrough
CT: control target
= control target key end

     0   :  { %7 = vsyncpa [#allocation4], 0  ;;  %s1406_s9 = smov 0   ;;  %s2026_s0 = inlined_call_operand.vmem [shape: f32[6,9,256], index: 0, kind: input, shape index: {}]   ;;  %s2027_s1 = inlined_call_operand.vmem [shape: f32[6,10,256], index: 1, kind: input, shape index: {}]   ;;  %s2028_s2 = inlined_call_operand.hbm [shape: f32[4], index: 2, kind: output, shape index: {}]  }
   0x1 LB: > { %s1412_s10 = sadd.s32 4294967295, %s1385_s9   ;;  %p1202_p0 = scmp.ge.s32.totalorder %s1385_s9, 1  ;;  %s1385_s9 = sphi %s1406_s9, %s13_s9  }
   0x2   : > { %p122_p1 = scmp.lt.s32.totalorder %s1385_s9, 4 }
   0x4   : > { %p123_p2 = pnand %p1202_p0, %p122_p1 }
   0x6   : > { %126 = sbr.rel (%p123_p2) target bundleno = 499 (0x1f3), region = 28 }
   0xb   : > { %s1203_s11 = sshll.u32 %s1412_s10, 1  ;;  %v190_v0 = vlaneseq  ;;  %v1387_v3 = vmov 1966171168   ;;  %vm611_vm0 = vcmask 1040384   ;;  %p1248_p4 = scmp.eq.s32.totalorder %s1412_s10, 0 }
   0xc   : > { %p147_p3 = scmp.lt.s32.totalorder %s1203_s11, 5  ;;  %v199_v4 = vunpack.c.l.s4 %v1387_v3  ;;  %s236_s14 = scvt.s32.f32 %s1203_s11 }
   0xd   : > { %v1417_v1 = vand.u32 127, %v190_v0  ;;  %v202_v2 = vshrl.u32 %v190_v0, 7  ;;  %s1389_s21 = smov 0.0   ;;  %p1215_p5 = scmp.ne.s32.totalorder %s1412_s10, 2 }
   0xe   : > { %s1419_s12 = scalar_select %p147_p3, %s1203_s11, 5  ;;  %v200_v9 = vunpack.c.0.s8 %v199_v4  ;;  %v1455_v17 = vstv %s236_s14 }
   0xf   : > { %v192_v5 = vadd.s32 128, %v1417_v1  ;;  %v1436_v8 = vsub.s32 0, %v202_v2  ;;  %v234_v14 = vcvt.s32.f32 %v202_v2  ;;  %v1450_v15 = vsub.s32 1, %v202_v2  ;;  %1239 = sst [smem:[#allocation2]] (%p1248_p4), %s1389_s21 }
  0x10   : > { %s1224_s13 = sshll.u32 %s1419_s12, 5  ;;  %v193_v20 = vcvt.s32.f32 %v1417_v1  ;;  %v1465_v25 = vsub.s32 %v200_v9, %v202_v2  ;;  %1240 = sst [smem:[#allocation2 + $0x1]] (%p1248_p4), %s1389_s21 }
  0x11   : > { %s1427_s17 = scalar_lea.vmem %s2026_s0, %s1224_s13  ;;  %v194_v21 = vcvt.s32.f32 %v192_v5  ;;  %v1469_v27 = vrot.slane %v234_v14, %v1436_v8  ;;  %v1472_v28 = vrot.slane %v234_v14, %v1450_v15  ;;  %s1486_s20 = scalar_lea.vmem %s2027_s1, %s1224_s13 }
  0x12   : > { %v1431_v6 = vld [vmem:[%s1427_s17 + $0x8] sm:$0xff]  ;;  %v1434_v7 = vld [vmem:[%s1427_s17 + $0x20] sm:$0xff]  ;;  %v184_v0 = vld [vmem:[%s1486_s20 + $0x10] sm:$0x3]  ;;  %1241 = sst [smem:[#allocation2 + $0x2]] (%p1248_p4), %s1389_s21 }
  0x13   : > { %v1439_v10 = vld [vmem:[%s1427_s17] sm:$0xff]  ;;  %v1442_v11 = vld [vmem:[%s1427_s17 + $0x28] sm:$0xff]  ;;  %v1445_v12 = vsub.f32 0.0, %v1431_v6  ;;  %v1448_v13 = vsub.f32 0.0, %v1434_v7  ;;  %v357_v26 = vmul.f32 1.442695, %v1431_v6  ;;  %v1494_v51 = vcombine.low %v193_v20, %v194_v21 }
  0x14   : > { %v1453_v16 = vsub.f32 0.0, %v1442_v11  ;;  %v1461_v22 = vsub.f32 0.0, %v1439_v10  ;;  %v355_v24 = vmul.f32 1.442695, %v1439_v10  ;;  %v359_v29 = vmul.f32 1.442695, %v1434_v7 }
  0x15   : > { %v285_v18 = vmul.f32 1.442695, %v1445_v12  ;;  %v287_v19 = vmul.f32 1.442695, %v1448_v13  ;;  %v633_v31 = vand.u32 2147483647, %v1445_v12 }
  0x16   : > { %v289_v23 = vmul.f32 1.442695, %v1453_v16  ;;  %v632_v30 = vand.u32 2147483647, %v1461_v22  ;;  %v634_v32 = vand.u32 2147483647, %v1448_v13 }
  0x17   : > { %1263 = vpow2.f32 %v285_v18  ;;  %v635_v33 = vand.u32 2147483647, %v1453_v16  ;;  %v728_v34 = vand.u32 2147483647, %v1439_v10  ;;  %v637_v36 = vsub.f32 0.0, %v633_v31  ;;  %v1491_v48 = vld [vmem:[%s1486_s20] sm:$0xff] }
  0x18   : > { %1265 = vpow2.f32 %v287_v19  ;;  %v636_v35 = vsub.f32 0.0, %v632_v30  ;;  %v729_v37 = vand.u32 2147483647, %v1431_v6  ;;  %v638_v38 = vsub.f32 0.0, %v634_v32  ;;  %v1497_v52 = vld [vmem:[%s1486_s20 + $0x8] sm:$0xff]  ;;  %v1501_v56 = vld [vmem:[%s1486_s20 + $0x20] sm:$0xff] }
  0x19   : > { %1267 = vpow2.f32 %v289_v23  ;;  %v639_v39 = vsub.f32 0.0, %v635_v33  ;;  %v730_v40 = vand.u32 2147483647, %v1434_v7  ;;  %v642_v42 = vmul.f32 1.442695, %v637_v36  ;;  %v1512_v60 = vld [vmem:[%s1486_s20 + $0x28] sm:$0xff] }
  0x1a   : > { %1269 = vpow2.f32 %v355_v24  ;;  %v640_v41 = vmul.f32 1.442695, %v636_v35  ;;  %v731_v43 = vand.u32 2147483647, %v1442_v11  ;;  %v644_v44 = vmul.f32 1.442695, %v638_v38 }
  0x1b   : > { %1271 = vpow2.f32 %v357_v26  ;;  %v646_v45 = vmul.f32 1.442695, %v639_v39  ;;  %v732_v46 = vsub.f32 0.0, %v728_v34  ;;  %v733_v47 = vsub.f32 0.0, %v729_v37  ;;  %v185_v4 = vld [vmem:[%s1486_s20 + $0x18] sm:$0x3] }
  0x1c   : > { %1273 = vpow2.f32 %v359_v29  ;;  %v734_v49 = vsub.f32 0.0, %v730_v40  ;;  %v361_v53 = vmul.f32 1.442695, %v1442_v11  ;;  %v735_v54 = vsub.f32 0.0, %v731_v43  ;;  %v188_v18 = vld [vmem:[%s1486_s20 + $0x30] sm:$0x3] }
  0x1d   : > { %1275 = vpow2.f32 %v640_v41  ;;  %v736_v55 = vmul.f32 1.442695, %v732_v46  ;;  %v738_v57 = vmul.f32 1.442695, %v733_v47  ;;  %v1505_v58 = vrot.slane %v1491_v48, %v1436_v8  ;;  %v189_v20 = vld [vmem:[%s1486_s20 + $0x38] sm:$0x3] }
  0x1e   : > { %1277 = vpow2.f32 %v642_v42  ;;  %v1509_v59 = vrot.slane %v1497_v52, %v1436_v8  ;;  %v740_v63 = vmul.f32 1.442695, %v734_v49  ;;  %v283_v3 = vmul.f32 1.442695, %v1461_v22  ;;  %v176_v42 = vld [vmem:[%s1427_s17 + $0x10] sm:$0x1] }
  0x1f   : > { %1279 = vpow2.f32 %v644_v44  ;;  %2042 = vst [vmem:[#allocation6_spill] sm:$0xff] %v1505_v58  ;;  %v742_v5 = vmul.f32 1.442695, %v735_v54  ;;  %v832_v21 = vmul.f32 2.0, %v1491_v48  ;;  %v1527_v23 = vmul.f32 2.0, %v1497_v52  ;;  %1242 = sst [smem:[#allocation2 + $0x3]] (%p1248_p4), %s1389_s21 }
  0x20   : > { %2043 = vst [vmem:[#allocation7_spill] sm:$0xff] %v1509_v59  ;;  %1281 = vpow2.f32 %v646_v45  ;;  %v1529_v24 = vmul.f32 2.0, %v184_v0  ;;  %v1531_v30 = vmul.f32 2.0, %v185_v4  ;;  %v1534_v31 = vmul.f32 2.0, %v1501_v56  ;;  %v177_v47 = vld [vmem:[%s1427_s17 + $0x18] sm:$0x1] }
  0x21   : > { %1283 = vpow2.f32 %v736_v55  ;;  %v1537_v34 = vmul.f32 2.0, %v1512_v60  ;;  %v1539_v35 = vmul.f32 2.0, %v188_v18  ;;  %v1544_v39 = vmul.f32 2.0, %v189_v20  ;;  %v180_v55 = vld [vmem:[%s1427_s17 + $0x30] sm:$0x1]  ;;  %1243 = sst [smem:[#allocation2 + $0x4]] (%p1248_p4), %s1389_s21 }
  0x22   : > { %1285 = vpow2.f32 %v361_v53  ;;  %v1548_v40 = vrot.slane %v1501_v56, %v1436_v8  ;;  %v840_v43 = vsub.f32 1.0, %v832_v21  ;;  %v841_v44 = vsub.f32 1.0, %v1527_v23  ;;  %v181_v4 = vld [vmem:[%s1427_s17 + $0x38] sm:$0x1]  ;;  %s1094_s22 = sld [smem:[#allocation2]] }
  0x23   : > { %1287 = vpow2.f32 %v738_v57  ;;  %v1556_v45 = vrot.slane %v1512_v60, %v1436_v8  ;;  %v844_v54 = vsub.f32 1.0, %v1534_v31  ;;  %v856_v0 = vrot.slane %v1439_v10, 7  ;;  %s1211_s23 = sld [smem:[#allocation2 + $0x1]] }
  0x24   : > { %v1264_v19 = vpop.eup %1263  ;;  %1289 = vpow2.f32 %v740_v63  ;;  %2045 = vst [vmem:[#allocation9_spill] sm:$0xff] %v1548_v40  ;;  %v857_v18 = vrot.slane %v1431_v6, 7  ;;  %v864_v14 = vrot.slane %v180_v55, 7  ;;  %v866_v50 = vrot.slane %v181_v4, 7  ;;  %s1212_s24 = sld [smem:[#allocation2 + $0x2]] }
  0x25   : > { %v1266_v26 = vpop.eup %1265  ;;  %v292_v29 = vadd.f32 1.0, %v1264_v19  ;;  %1291 = vpow2.f32 %v283_v3  ;;  %2047 = vst [vmem:[#allocation11_spill] sm:$0xff] %v1556_v45  ;;  %v858_v19 = vrot.slane %v176_v42, 7  ;;  %v1573_v2 = vmul.f32 %v856_v0, %v840_v43  ;;  %s1213_s25 = sld [smem:[#allocation2 + $0x3]] }
  0x26   : > { %v1268_v32 = vpop.eup %1267  ;;  %v293_v33 = vadd.f32 1.0, %v1266_v26  ;;  %1293 = vpow2.f32 %v742_v5  ;;  %v860_v26 = vrot.slane %v177_v47, 7  ;;  %v1581_v43 = vmul.f32 %v857_v18, %v841_v44  ;;  %s1214_s27 = sld [smem:[#allocation2 + $0x4]] }
  0x27   : > { %v1541_v36 = vpop.eup %1269  ;;  %v294_v37 = vadd.f32 1.0, %v1268_v32  ;;  %1295 = vrcp.f32 %v292_v29  ;;  %v862_v29 = vrot.slane %v1434_v7, 7  ;;  %v1576_v47 = vsel %vm611_vm0, %v856_v0, %v858_v19 }
  0x28   : > { %2044 = vst [vmem:[#allocation8_spill] sm:$0xff] %v1541_v36  ;;  %v1550_v41 = vpop.eup %1271  ;;  %1297 = vrcp.f32 %v293_v33  ;;  %v861_v4 = vsel %vm611_vm0, %v857_v18, %v860_v26 }
  0x29   : > { %2046 = vst [vmem:[#allocation10_spill] sm:$0xff] %v1550_v41  ;;  %v1558_v46 = vpop.eup %1273  ;;  %1299 = vrcp.f32 %v294_v37  ;;  %v1584_v0 = vmul.f32 %v862_v29, %v844_v54 }
  0x2a   : > { %2048 = vst [vmem:[#allocation12_spill] sm:$0xff] %v1558_v46  ;;  %v1276_v3 = vpop.eup %1275 }
  0x2b   : > { %v1278_v20 = vpop.eup %1277  ;;  %v648_v21 = vadd.f32 1.0, %v1276_v3  ;;  %v651_v23 = vmul.f32 -0.5, %v1276_v3  ;;  %v654_v62 = vand.u32 2147483647, %v1276_v3 }
  0x2c   : > { %v1280_v31 = vpop.eup %1279  ;;  %v657_v32 = vadd.f32 1.0, %v1278_v20  ;;  %v660_v33 = vmul.f32 -0.5, %v1278_v20  ;;  %v663_v63 = vand.u32 2147483647, %v1278_v20 }
  0x2d   : > { %v1282_v9 = vpop.eup %1281  ;;  %1301 = vlog2.f32 %v648_v21  ;;  %v666_v37 = vadd.f32 1.0, %v1280_v31  ;;  %v652_v42 = vadd.f32 1.0, %v651_v23  ;;  %v669_v53 = vmul.f32 -0.5, %v1280_v31 }
  0x2e   : > { %v1284_v1 = vpop.eup %1283  ;;  %1303 = vlog2.f32 %v657_v32  ;;  %v661_v5 = vadd.f32 1.0, %v660_v33  ;;  %v675_v57 = vadd.f32 1.0, %v1282_v9  ;;  %v678_v21 = vmul.f32 -0.5, %v1282_v9 }
  0x2f   : > { %v1578_v61 = vpop.eup %1285  ;;  %1305 = vlog2.f32 %v666_v37  ;;  %v744_v23 = vadd.f32 1.0, %v1284_v1  ;;  %v865_v32 = vsel %vm611_vm0, %v862_v29, %v864_v14  ;;  %v653_v38 = vmul.f32 %v1276_v3, %v652_v42 }
  0x30   : > { %2049 = vst [vmem:[#allocation13_spill] sm:$0xff] %v1578_v61  ;;  %v1288_v55 = vpop.eup %1287  ;;  %1307 = vlog2.f32 %v675_v57  ;;  %vm1586_vm1 = vcmp.lt.f32.partialorder %v654_v62, 0.0004427343  ;;  %v747_v37 = vmul.f32 -0.5, %v1284_v1  ;;  %v2052_v61 = vrot.slane %v1442_v11, 7 }
  0x31   : > { %v1290_v49 = vpop.eup %1289  ;;  %v1593_v44 = vmul.f32 %v1278_v20, %v661_v5  ;;  %vm1595_vm2 = vcmp.lt.f32.partialorder %v663_v63, 0.0004427343  ;;  %v672_v14 = vand.u32 2147483647, %v1280_v31  ;;  %1309 = vlog2.f32 %v744_v23 }
  0x32   : > { %v1292_v19 = vpop.eup %1291  ;;  %v867_v26 = vsel %vm611_vm0, %v2052_v61, %v866_v50  ;;  %v753_v54 = vadd.f32 1.0, %v1288_v55  ;;  %v670_v3 = vadd.f32 1.0, %v669_v53  ;;  %v679_v62 = vadd.f32 1.0, %v678_v21 }
  0x33   : > { %v1294_v18 = vpop.eup %1293  ;;  %v681_v29 = vand.u32 2147483647, %v1282_v9  ;;  %v756_v42 = vmul.f32 -0.5, %v1288_v55  ;;  %v291_v41 = vadd.f32 1.0, %v1292_v19  ;;  %v750_v36 = vand.u32 2147483647, %v1284_v1 }
  0x34   : > { %v1599_v46 = vpop.eup %1295  ;;  %v762_v45 = vadd.f32 1.0, %v1290_v49  ;;  %v765_v50 = vmul.f32 -0.5, %v1290_v49  ;;  %v748_v63 = vadd.f32 1.0, %v747_v37  ;;  %1311 = vlog2.f32 %v753_v54 }
  0x35   : > { %2055 = vst [vmem:[#allocation14_spill] sm:$0xff] %v1599_v46  ;;  %v1601_v61 = vpop.eup %1297  ;;  %v757_v5 = vadd.f32 1.0, %v756_v42  ;;  %v759_v20 = vand.u32 2147483647, %v1288_v55  ;;  %v771_v53 = vadd.f32 1.0, %v1294_v18  ;;  %v774_v21 = vmul.f32 -0.5, %v1294_v18 }
  0x36   : > { %2056 = vst [vmem:[#allocation15_spill] sm:$0xff] %v1601_v61  ;;  %v1603_v40 = vpop.eup %1299  ;;  %1313 = vlog2.f32 %v762_v45  ;;  %v766_v23 = vadd.f32 1.0, %v765_v50  ;;  %v671_v59 = vmul.f32 %v1280_v31, %v670_v3  ;;  %vm1605_vm3 = vcmp.lt.f32.partialorder %v672_v14, 0.0004427343 }
  0x37   : > { %2057 = vst [vmem:[#allocation16_spill] sm:$0xff] %v1603_v40  ;;  %vm1609_vm4 = vcmp.lt.f32.partialorder %v681_v29, 0.0004427343  ;;  %v768_v61 = vand.u32 2147483647, %v1290_v49  ;;  %v680_v37 = vmul.f32 %v1282_v9, %v679_v62  ;;  %1315 = vlog2.f32 %v771_v53 }
  0x38   : > { %vm1613_vm5 = vcmp.lt.f32.partialorder %v750_v36, 0.0004427343  ;;  %v775_v45 = vadd.f32 1.0, %v774_v21  ;;  %1317 = vrcp.f32 %v291_v41  ;;  %v749_v50 = vmul.f32 %v1284_v1, %v748_v63 }
  0x39   : > { %v1617_v31 = vmul.f32 %v1288_v55, %v757_v5  ;;  %v777_v14 = vand.u32 2147483647, %v1294_v18  ;;  %vm1619_vm6 = vcmp.lt.f32.partialorder %v759_v20, 0.0004427343  ;;  %v1623_v46 = vmul.f32 %v1290_v49, %v766_v23 }
  0x3a   : > { %v1302_v42 = vpop.eup %1301  ;;  %v2066_v9 = vsub.f32 1.0, %v1529_v24  ;;  %v2067_v62 = vsub.f32 1.0, %v1531_v30  ;;  %vm1634_vm7 = vcmp.lt.f32.partialorder %v768_v61, 0.0004427343  ;;  %v2070_v5 = vsub.f32 1.0, %v1537_v34 }
  0x3b   : > { %v1304_v3 = vpop.eup %1303  ;;  %v650_v40 = vmul.f32 0.6931472, %v1302_v42  ;;  %v2071_v49 = vrot.slane %v1442_v11, 7  ;;  %v2072_v24 = vsub.f32 1.0, %v1539_v35  ;;  %v2073_v30 = vsub.f32 1.0, %v1544_v39 }
  0x3c   : > { %v1628_v36 = vmul.f32 %v1576_v47, %v2066_v9  ;;  %v1632_v41 = vmul.f32 %v861_v4, %v2067_v62  ;;  %v1306_v1 = vpop.eup %1305  ;;  %v659_v55 = vmul.f32 0.6931472, %v1304_v3  ;;  %v776_v53 = vmul.f32 %v1294_v18, %v775_v45 }
  0x3d   : > { %v1642_v20 = vmul.f32 %v2071_v49, %v2070_v5  ;;  %v1646_v47 = vmul.f32 %v865_v32, %v2072_v24  ;;  %v1650_v4 = vmul.f32 %v867_v26, %v2073_v30  ;;  %v656_v61 = vsel %vm1586_vm1, %v653_v38, %v650_v40  ;;  %v1308_v34 = vpop.eup %1307 }
  0x3e   : > { %v668_v23 = vmul.f32 0.6931472, %v1306_v1  ;;  %v884_v21 = vmax.f32 %v1573_v2, 0.0  ;;  %v665_v42 = vsel %vm1595_vm2, %v1593_v44, %v659_v55  ;;  %v2074_v35 = vmax.f32 %v1461_v22, 0.0  ;;  %v1310_v57 = vpop.eup %1309 }
  0x3f   : > { %vm1660_vm8 = vcmp.lt.f32.partialorder %v777_v14, 0.0004427343  ;;  %v885_v39 = vmax.f32 %v1581_v43, 0.0  ;;  %v892_v38 = vand.u32 2147483647, %v1573_v2  ;;  %v2077_v26 = vmax.f32 %v1445_v12, 0.0 }
  0x40   : > { %v684_v32 = vadd.f32 %v656_v61, %v2074_v35  ;;  %v674_v40 = vsel %vm1605_vm3, %v671_v59, %v668_v23  ;;  %v677_v33 = vmul.f32 0.6931472, %v1308_v34  ;;  %v893_v44 = vand.u32 2147483647, %v1581_v43 }
  0x41   : > { %v685_v18 = vadd.f32 %v665_v42, %v2077_v26  ;;  %v2078_v22 = vmax.f32 %v1448_v13, 0.0  ;;  %v894_v9 = vand.u32 2147483647, %v1628_v36  ;;  %v895_v62 = vand.u32 2147483647, %v1632_v41  ;;  %v1312_v30 = vpop.eup %1311 }
  0x42   : > { %v688_v14 = vmin.f32 %v684_v32, 100.0  ;;  %v683_v1 = vsel %vm1609_vm4, %v680_v37, %v677_v33  ;;  %v746_v59 = vmul.f32 0.6931472, %v1310_v57  ;;  %v896_v55 = vand.u32 2147483647, %v1584_v0 }
  0x43   : > { %v686_v45 = vadd.f32 %v674_v40, %v2078_v22  ;;  %v689_v58 = vmin.f32 %v685_v18, 100.0  ;;  %v2079_v12 = vmax.f32 %v1453_v16, 0.0  ;;  %v897_v13 = vand.u32 2147483647, %v1642_v20  ;;  %v1314_v37 = vpop.eup %1313 }
  0x44   : > { %v696_v24 = vrot.slane %v688_v14, 4  ;;  %v752_v23 = vsel %vm1613_vm5, %v749_v50, %v746_v59  ;;  %v898_v34 = vand.u32 2147483647, %v1646_v47  ;;  %v899_v19 = vand.u32 2147483647, %v1650_v4  ;;  %v1316_v22 = vpop.eup %1315 }
  0x45   : > { %v687_v5 = vadd.f32 %v683_v1, %v2079_v12  ;;  %v690_v49 = vmin.f32 %v686_v45, 100.0  ;;  %v697_v61 = vrot.slane %v689_v58, 4  ;;  %v755_v16 = vmul.f32 0.6931472, %v1312_v30  ;;  %v1694_v1 = vpop.eup %1317 }
  0x46   : > { %v704_v32 = vmul.f32 %v696_v24, %v1491_v48  ;;  %v764_v33 = vmul.f32 0.6931472, %v1314_v37  ;;  %v2080_v26 = vmax.f32 %v1439_v10, 0.0  ;;  %v900_v57 = vsub.f32 0.0, %v892_v38 }
  0x47   : > { %v691_v42 = vmin.f32 %v687_v5, 100.0  ;;  %v698_v35 = vrot.slane %v690_v49, 4  ;;  %v705_v40 = vmul.f32 %v697_v61, %v1497_v52  ;;  %v761_v14 = vsel %vm1619_vm6, %v1617_v31, %v755_v16 }
  0x48   : > { %v780_v18 = vadd.f32 %v752_v23, %v2080_v26  ;;  %v708_v45 = vsel %vm611_vm0, %v704_v32, 0.0  ;;  %v770_v10 = vsel %vm1634_vm7, %v1623_v46, %v764_v33  ;;  %v773_v59 = vmul.f32 0.6931472, %v1316_v22 }
  0x49   : > { %v699_v54 = vrot.slane %v691_v42, 4  ;;  %v706_v50 = vmul.f32 %v698_v35, %v1501_v56  ;;  %v709_v58 = vsel %vm611_vm0, %v705_v40, 0.0  ;;  %v2081_v38 = vmax.f32 %v1431_v6, 0.0 }
  0x4a   : > { %v710_v49 = vadd.f32 %v709_v58, %v708_v45  ;;  %v2082_v29 = vmax.f32 %v1434_v7, 0.0  ;;  %v779_v30 = vsel %vm1660_vm8, %v776_v53, %v773_v59  ;;  %v784_v61 = vmin.f32 %v780_v18, 100.0 }
  0x4b   : > { %v781_v12 = vadd.f32 %v761_v14, %v2081_v38  ;;  %v707_v5 = vmul.f32 %v699_v54, %v1512_v60  ;;  %v711_v24 = vsel %vm611_vm0, %v706_v50, 0.0  ;;  %v901_v37 = vsub.f32 0.0, %v893_v44 }
  0x4c   : > { %v782_v31 = vadd.f32 %v770_v10, %v2082_v29  ;;  %v712_v63 = vadd.f32 %v711_v24, %v710_v49  ;;  %v2083_v6 = vmax.f32 %v1442_v11, 0.0  ;;  %v792_v32 = vrot.slane %v784_v61, 3 }
  0x4d   : > { %v785_v23 = vmin.f32 %v781_v12, 100.0  ;;  %v713_v46 = vsel %vm611_vm0, %v707_v5, 0.0  ;;  %v902_v40 = vsub.f32 0.0, %v894_v9  ;;  %v903_v33 = vsub.f32 0.0, %v895_v62 }
  0x4e   : > { %v783_v42 = vadd.f32 %v779_v30, %v2083_v6  ;;  %v786_v35 = vmin.f32 %v782_v31, 100.0  ;;  %v714_v26 = vadd.f32 %v713_v46, %v712_v63  ;;  %v904_v54 = vsub.f32 0.0, %v896_v55 }
  0x4f   : > { %v793_v16 = vrot.slane %v785_v23, 3  ;;  %v800_v53 = vmul.f32 %v792_v32, %v1491_v48  ;;  %v905_v44 = vsub.f32 0.0, %v897_v13  ;;  %v906_v18 = vsub.f32 0.0, %v898_v34 }
  0x50   : > { %v787_v7 = vmin.f32 %v783_v42, 100.0  ;;  %v794_v22 = vrot.slane %v786_v35, 3  ;;  %715 = vadd.xlane.f32.xlu0 %v714_v26  ;;  %v907_v45 = vsub.f32 0.0, %v899_v19  ;;  %v908_v14 = vmul.f32 1.442695, %v900_v57 }
  0x51   : > { %v801_v3 = vmul.f32 %v793_v16, %v1497_v52  ;;  %v808_v58 = vrot.slane %v800_v53, 1  ;;  %v910_v9 = vmul.f32 1.442695, %v901_v37  ;;  %v912_v62 = vmul.f32 1.442695, %v902_v40 }
  0x52   : > { %v795_v50 = vrot.slane %v787_v7, 3  ;;  %v802_v11 = vmul.f32 %v794_v22, %v1501_v56  ;;  %1319 = vpow2.f32 %v908_v14  ;;  %v914_v55 = vmul.f32 1.442695, %v903_v33 }
  0x53   : > { %v809_v10 = vrot.slane %v801_v3, 1  ;;  %v816_v12 = vsel %vm611_vm0, %v808_v58, 0.0  ;;  %1321 = vpow2.f32 %v910_v9  ;;  %v916_v34 = vmul.f32 1.442695, %v904_v54 }
  0x54   : > { %v803_v59 = vmul.f32 %v795_v50, %v1512_v60  ;;  %v810_v38 = vrot.slane %v802_v11, 1  ;;  %1323 = vpow2.f32 %v912_v62  ;;  %v918_v57 = vmul.f32 1.442695, %v905_v44 }
  0x55   : > { %v817_v13 = vsel %vm611_vm0, %v809_v10, 0.0  ;;  %1325 = vpow2.f32 %v914_v55  ;;  %v920_v24 = vmul.f32 1.442695, %v906_v18  ;;  %v922_v29 = vmul.f32 1.442695, %v907_v45 }
  0x56   : > { %v811_v5 = vrot.slane %v803_v59, 1  ;;  %v818_v49 = vadd.f32 %v817_v13, %v816_v12  ;;  %v819_v19 = vsel %vm611_vm0, %v810_v38, 0.0  ;;  %1327 = vpow2.f32 %v916_v34 }
  0x57   : > { %v204_v61 = vrot.slane %v1494_v51, %v1465_v25  ;;  %1329 = vpow2.f32 %v918_v57  ;;  %v1723_v23 = vadd.f32 %v1455_v17, %v1469_v27  ;;  %v1727_v37 = vadd.f32 %v1455_v17, %v1472_v28 }
  0x58   : > { %v820_v31 = vadd.f32 %v819_v19, %v818_v49  ;;  %v821_v30 = vsel %vm611_vm0, %v811_v5, 0.0  ;;  %v419_v63 = vmul.f32 0.5, %v1491_v48  ;;  %1331 = vpow2.f32 %v920_v24 }
  0x59   : > { %v205_v6 = vcombine.high %v204_v61, %v204_v61  ;;  %v1731_v42 = vrot.slane %v204_v61, %v1465_v25  ;;  %1333 = vpow2.f32 %v922_v29  ;;  %v251_v51 = vadd.f32 0.5, %v1723_v23 }
  0x5a   : > { %v822_v46 = vadd.f32 %v821_v30, %v820_v31  ;;  %v252_v35 = vadd.f32 0.5, %v1727_v37  ;;  %v420_v27 = vmul.f32 0.5, %v1497_v52  ;;  %v1741_v28 = vmul.f32 0.5, %v1501_v56 }
  0x5b   : > { %v1737_v32 = vrot.slane %v205_v6, %v1465_v25  ;;  %v222_v17 = vadd.f32 0.5, %v1731_v42  ;;  %v1744_v16 = vmul.f32 0.5, %v1512_v60  ;;  %v253_v40 = vmul.f32 0.33333334, %v251_v51 }
  0x5c   : > { %823 = vadd.xlane.f32.xlu1 %v822_v46  ;;  %v254_v33 = vmul.f32 0.33333334, %v252_v35  ;;  %v427_v26 = vrot.slane %v419_v63, 2  ;;  %v428_v7 = vrot.slane %v420_v27, 2  ;;  %v2041_v53 = vrot.slane %v1741_v28, 2 }
  0x5d   : > { %v223_v22 = vadd.f32 0.5, %v1737_v32  ;;  %v224_v54 = vmul.f32 0.0625, %v222_v17  ;;  %v2040_v25 = vrot.slane %v1744_v16, 2  ;;  %v886_v3 = vmax.f32 %v1628_v36, 0.0  ;;  %v2100_v36 = vld [vmem:[#allocation6_spill] sm:$0xff] }
  0x5e   : > { %v887_v44 = vmax.f32 %v1632_v41, 0.0  ;;  %v255_v18 = vfloor.f32 %v253_v40  ;;  %v256_v50 = vfloor.f32 %v254_v33  ;;  %v888_v11 = vmax.f32 %v1584_v0, 0.0 }
  0x5f   : > { %v1320_v10 = vpop.eup %1319  ;;  %v225_v9 = vmul.f32 0.0625, %v223_v22  ;;  %v1755_v62 = vfloor.f32 %v224_v54  ;;  %v1758_v59 = vsub.f32 %v1491_v48, %v427_v26  ;;  %v1761_v38 = vsub.f32 %v1497_v52, %v428_v7 }
  0x60   : > { %v1322_v55 = vpop.eup %1321  ;;  %v924_v12 = vadd.f32 1.0, %v1320_v10  ;;  %v927_v13 = vmul.f32 -0.5, %v1320_v10  ;;  %v1766_v34 = vsub.f32 %v1501_v56, %v2041_v53  ;;  %v1771_v5 = vsub.f32 %v1512_v60, %v2040_v25 }
  0x61   : > { %v1324_v49 = vpop.eup %1323  ;;  %v933_v19 = vadd.f32 1.0, %v1322_v55  ;;  %v936_v57 = vmul.f32 -0.5, %v1322_v55  ;;  %v257_v24 = vmul.f32 3.0, %v255_v18  ;;  %v1773_v29 = vmul.f32 3.0, %v256_v50 }
  0x62   : > { %v1326_v31 = vpop.eup %1325  ;;  %1335 = vlog2.f32 %v924_v12  ;;  %v942_v30 = vadd.f32 1.0, %v1324_v49  ;;  %v1776_v61 = vadd.f32 %v427_v26, %v1491_v48  ;;  %v1779_v56 = vadd.f32 %v428_v7, %v1497_v52 }
  0x63   : > { %v1328_v63 = vpop.eup %1327  ;;  %v928_v46 = vadd.f32 1.0, %v927_v13  ;;  %v930_v6 = vand.u32 2147483647, %v1320_v10  ;;  %1337 = vlog2.f32 %v933_v19  ;;  %v945_v60 = vmul.f32 -0.5, %v1324_v49 }
  0x64   : > { %v1330_v51 = vpop.eup %1329  ;;  %v939_v35 = vand.u32 2147483647, %v1322_v55  ;;  %1339 = vlog2.f32 %v942_v30  ;;  %v951_v27 = vadd.f32 1.0, %v1326_v31  ;;  %v1781_v17 = vfloor.f32 %v225_v9 }
  0x65   : > { %v1332_v40 = vpop.eup %1331  ;;  %v937_v33 = vadd.f32 1.0, %v936_v57  ;;  %v948_v22 = vand.u32 2147483647, %v1324_v49  ;;  %v954_v54 = vmul.f32 -0.5, %v1326_v31  ;;  %v228_v48 = vmul.f32 16.0, %v1755_v62 }
  0x66   : > { %v1334_v26 = vpop.eup %1333  ;;  %v946_v52 = vadd.f32 1.0, %v945_v60  ;;  %1341 = vlog2.f32 %v951_v27  ;;  %v960_v7 = vadd.f32 1.0, %v1328_v63  ;;  %v963_v18 = vmul.f32 -0.5, %v1328_v63 }
  0x67   : > { %v929_v50 = vmul.f32 %v1320_v10, %v928_v46  ;;  %vm1784_vm9 = vcmp.lt.f32.partialorder %v930_v6, 0.0004427343  ;;  %v955_v13 = vadd.f32 1.0, %v954_v54  ;;  %v957_v19 = vand.u32 2147483647, %v1326_v31 }
  0x68   : > { %vm1788_vm10 = vcmp.lt.f32.partialorder %v939_v35, 0.0004427343  ;;  %1343 = vlog2.f32 %v960_v7  ;;  %v964_v57 = vadd.f32 1.0, %v963_v18  ;;  %v969_v30 = vadd.f32 1.0, %v1330_v51 }
  0x69   : > { %v972_v25 = vmul.f32 -0.5, %v1330_v51  ;;  %v938_v53 = vmul.f32 %v1322_v55, %v937_v33  ;;  %vm1792_vm11 = vcmp.lt.f32.partialorder %v948_v22, 0.0004427343  ;;  %v966_v10 = vand.u32 2147483647, %v1328_v63 }
  0x6a   : > { %v978_v46 = vadd.f32 1.0, %v1332_v40  ;;  %v947_v6 = vmul.f32 %v1324_v49, %v946_v52  ;;  %1345 = vlog2.f32 %v969_v30  ;;  %v981_v54 = vmul.f32 -0.5, %v1332_v40 }
  0x6b   : > { %v973_v27 = vadd.f32 1.0, %v972_v25  ;;  %v1796_v58 = vmul.f32 %v1326_v31, %v955_v13  ;;  %vm1798_vm12 = vcmp.lt.f32.partialorder %v957_v19, 0.0004427343  ;;  %v975_v7 = vand.u32 2147483647, %v1330_v51 }
  0x6c   : > { %1347 = vlog2.f32 %v978_v46  ;;  %v987_v18 = vadd.f32 1.0, %v1334_v26  ;;  %v1802_v55 = vmul.f32 %v1328_v63, %v964_v57  ;;  %v982_v33 = vadd.f32 1.0, %v981_v54 }
  0x6d   : > { %v984_v22 = vand.u32 2147483647, %v1332_v40  ;;  %v990_v14 = vmul.f32 -0.5, %v1334_v26  ;;  %vm1804_vm13 = vcmp.lt.f32.partialorder %v966_v10, 0.0004427343  ;;  %v1808_v25 = vmul.f32 %v1330_v51, %v973_v27 }
  0x6e   : > { %1349 = vlog2.f32 %v987_v18  ;;  %v229_v49 = vmul.f32 16.0, %v1781_v17  ;;  %v1812_v31 = vsub.f32 %v1731_v42, %v228_v48  ;;  %v1814_v52 = vmul.f32 %v1332_v40, %v982_v33 }
  0x6f   : > { %v991_v13 = vadd.f32 1.0, %v990_v14  ;;  %v993_v63 = vand.u32 2147483647, %v1334_v26  ;;  %v1817_v19 = vsub.f32 %v1723_v23, %v257_v24  ;;  %v1336_v57 = vpop.eup %1335  ;;  %vm1819_vm14 = vcmp.lt.f32.partialorder %v975_v7, 0.0004427343 }
  0x70   : > { %v1824_v51 = vsub.f32 %v1737_v32, %v229_v49  ;;  %v1828_v10 = vsub.f32 %v1727_v37, %v1773_v29  ;;  %v308_v42 = vrot.slane %v1812_v31, %v1436_v8  ;;  %v312_v14 = vrot.slane %v1812_v31, %v1450_v15  ;;  %v1338_v23 = vpop.eup %1337 }
  0x71   : > { %v926_v24 = vmul.f32 0.6931472, %v1336_v57  ;;  %vm1834_vm15 = vcmp.lt.f32.partialorder %v984_v22, 0.0004427343  ;;  %v1838_v48 = vmul.f32 %v1334_v26, %v991_v13  ;;  %vm261_vm1 = vcmp.eq.f32.partialorder %v1817_v19, 0.0  ;;  %v1340_v37 = vpop.eup %1339 }
  0x72   : > { %vm267_vm2 = vcmp.eq.f32.partialorder %v1817_v19, 1.0  ;;  %v935_v32 = vmul.f32 0.6931472, %v1338_v23  ;;  %vm262_vm3 = vcmp.eq.f32.partialorder %v1828_v10, 0.0  ;;  %v1388_v29 = vmov 0.0  }
  0x73   : > { %v263_v46 = vsel %vm261_vm1, 1.25, %v1388_v29  ;;  %v265_v27 = vsel %vm261_vm1, 1.625, %v1388_v29  ;;  %v932_v54 = vsel %vm1784_vm9, %v929_v50, %v926_v24  ;;  %v944_v7 = vmul.f32 0.6931472, %v1340_v37  ;;  %v1342_v22 = vpop.eup %1341 }
  0x74   : > { %vm1845_vm4 = vcmp.lt.f32.partialorder %v993_v63, 0.0004427343  ;;  %v264_v26 = vsel %vm262_vm3, 1.25, %v1388_v29  ;;  %v266_v33 = vsel %vm262_vm3, 1.625, %v1388_v29  ;;  %v941_v49 = vsel %vm1788_vm10, %v938_v53, %v935_v32 }
  0x75   : > { %v996_v13 = vadd.f32 %v932_v54, %v884_v21  ;;  %vm1044_vm5 = vcmask 1041408   ;;  %vm268_vm6 = vcmp.eq.f32.partialorder %v1828_v10, 1.0  ;;  %v269_v50 = vsel %vm267_vm2, 2.0, %v263_v46  ;;  %v1344_v9 = vpop.eup %1343 }
  0x76   : > { %v950_v12 = vsel %vm1792_vm11, %v947_v6, %v944_v7  ;;  %v953_v63 = vmul.f32 0.6931472, %v1342_v22  ;;  %v997_v57 = vadd.f32 %v941_v49, %v885_v39  ;;  %vm1061_vm7 = vcmask 1043456  }
  0x77   : > { %v270_v23 = vsel %vm268_vm6, 2.0, %v264_v26  ;;  %v998_v2 = vadd.f32 %v950_v12, %v886_v3  ;;  %v1004_v21 = vmin.f32 %v996_v13, 100.0  ;;  %v271_v53 = vsel %vm267_vm2, 3.75, %v265_v27  ;;  %v1346_v43 = vpop.eup %1345 }
  0x78   : > { %v272_v24 = vsel %vm268_vm6, 3.75, %v266_v33  ;;  %v959_v60 = vsel %vm1798_vm12, %v1796_v58, %v953_v63  ;;  %v962_v6 = vmul.f32 0.6931472, %v1344_v9  ;;  %v1005_v37 = vmin.f32 %v997_v57, 100.0  ;;  %v2101_v58 = vld [vmem:[#allocation7_spill] sm:$0xff] }
  0x79   : > { %vm273_vm8 = vcmp.eq.f32.partialorder %v1817_v19, 2.0  ;;  %v999_v39 = vadd.f32 %v959_v60, %v887_v44  ;;  %v1006_v32 = vmin.f32 %v998_v2, 100.0  ;;  %v1028_v3 = vmul.f32 %v2100_v36, %v1004_v21  ;;  %v1348_v29 = vpop.eup %1347 }
  0x7a   : > { %vm274_vm9 = vcmp.eq.f32.partialorder %v1828_v10, 2.0  ;;  %v968_v46 = vsel %vm1804_vm13, %v1802_v55, %v962_v6  ;;  %v971_v35 = vmul.f32 0.6931472, %v1346_v43  ;;  %v1029_v27 = vmul.f32 %v2101_v58, %v1005_v37  ;;  %v2106_v43 = vld [vmem:[#allocation11_spill] sm:$0xff] }
  0x7b   : > { %v275_v54 = vsel %vm273_vm8, 4.125, %v269_v50  ;;  %v980_v7 = vmul.f32 0.6931472, %v1348_v29  ;;  %v1000_v41 = vadd.f32 %v968_v46, %v888_v11  ;;  %v1007_v44 = vmin.f32 %v999_v39, 100.0  ;;  %v1350_v33 = vpop.eup %1349  ;;  %v2107_v29 = vld [vmem:[#allocation14_spill] sm:$0xff] }
  0x7c   : > { %v1030_v26 = vmul.f32 %v2100_v36, %v1006_v32  ;;  %v977_v22 = vsel %vm1819_vm14, %v1808_v25, %v971_v35  ;;  %v1045_v45 = vrot.slane %v1028_v3, 6  ;;  %v1048_v55 = vrot.slane %v1029_v27, 6 }
  0x7d   : > { %v276_v49 = vsel %vm274_vm9, 4.125, %v270_v23  ;;  %v986_v13 = vsel %vm1834_vm15, %v1814_v52, %v980_v7  ;;  %v989_v50 = vmul.f32 0.6931472, %v1350_v33  ;;  %v2102_v0 = vmax.f32 %v1642_v20, 0.0  ;;  %v2104_v52 = vld [vmem:[#allocation9_spill] sm:$0xff]  ;;  %v2108_v7 = vld [vmem:[#allocation15_spill] sm:$0xff] }
  0x7e   : > { %v1008_v12 = vmin.f32 %v1000_v41, 100.0  ;;  %v2103_v63 = vmax.f32 %v1646_v47, 0.0  ;;  %v1031_v30 = vmul.f32 %v2101_v58, %v1007_v44  ;;  %v1046_v25 = vrot.slane %v1030_v26, 6 }
  0x7f   : > { %v1001_v11 = vadd.f32 %v977_v22, %v2102_v0  ;;  %v277_v9 = vsel %vm273_vm8, 2.875, %v271_v53  ;;  %v995_v23 = vsel %vm1845_vm4, %v1838_v48, %v989_v50  ;;  %v278_v20 = vsel %vm274_vm9, 2.875, %v272_v24 }
  0x80   : > { %v1002_v57 = vadd.f32 %v986_v13, %v2103_v63  ;;  %v1032_v2 = vmul.f32 %v2104_v52, %v1008_v12  ;;  %v2105_v21 = vmax.f32 %v1650_v4, 0.0  ;;  %v1047_v6 = vsel %vm1044_vm5, %v1045_v45, %v1046_v25  ;;  %v2110_v45 = vld [vmem:[#allocation8_spill] sm:$0xff]  ;;  %v2111_v63 = vld [vmem:[#allocation10_spill] sm:$0xff]  ;;  %v2113_v25 = vld [vmem:[#allocation13_spill] sm:$0xff] }
  0x81   : > { %v1009_v40 = vmin.f32 %v1001_v11, 100.0  ;;  %v1049_v37 = vrot.slane %v1031_v30, 6  ;;  %v1062_v39 = vsel %vm1061_vm7, %v1047_v6, 0.0  ;;  %v316_v48 = vrot.slane %v1824_v51, %v1436_v8 }
  0x82   : > { %v1003_v47 = vadd.f32 %v995_v23, %v2105_v21  ;;  %v1010_v60 = vmin.f32 %v1002_v57, 100.0  ;;  %v1051_v53 = vrot.slane %v1032_v2, 6  ;;  %v320_v4 = vrot.slane %v1824_v51, %v1450_v15  ;;  %v2109_v51 = vld [vmem:[#allocation16_spill] sm:$0xff] }
  0x83   : > { %v1033_v19 = vmul.f32 %v2106_v43, %v1009_v40  ;;  %v1050_v10 = vsel %vm1044_vm5, %v1048_v55, %v1049_v37  ;;  %v325_v3 = vadd.f32 %v1694_v1, %v308_v42  ;;  %v326_v46 = vadd.f32 %v2107_v29, %v312_v14 }
  0x84   : > { %v1011_v18 = vmin.f32 %v1003_v47, 100.0  ;;  %v1034_v32 = vmul.f32 %v2104_v52, %v1010_v60  ;;  %v1063_v36 = vsel %vm1061_vm7, %v1050_v10, 0.0  ;;  %v327_v41 = vadd.f32 %v2108_v7, %v316_v48 }
  0x85   : > { %v1054_v24 = vrot.slane %v1033_v19, 6  ;;  %v1064_v27 = vadd.f32 %v1063_v36, %v1062_v39  ;;  %v328_v44 = vadd.f32 %v2109_v51, %v320_v4  ;;  %v334_v26 = vrot.slane %v1755_v62, %v1436_v8 }
  0x86   : > { %v1035_v35 = vmul.f32 %v2106_v43, %v1011_v18  ;;  %v1052_v58 = vrot.slane %v1034_v32, 6  ;;  %v338_v33 = vrot.slane %v1755_v62, %v1450_v15  ;;  %v342_v42 = vrot.slane %v1781_v17, %v1436_v8 }
  0x87   : > { %v346_v22 = vrot.slane %v1781_v17, %v1450_v15  ;;  %v1935_v55 = vmul.f32 %v2110_v45, %v275_v54  ;;  %v351_v50 = vadd.f32 %v1694_v1, %v334_v26  ;;  %v1944_v57 = vmul.f32 %v2111_v63, %v275_v54  ;;  %v2112_v17 = vld [vmem:[#allocation12_spill] sm:$0xff] }
  0x88   : > { %v1053_v31 = vsel %vm1044_vm5, %v1051_v53, %v1052_v58  ;;  %v1055_v14 = vrot.slane %v1035_v35, 6  ;;  %v352_v0 = vadd.f32 %v2107_v29, %v338_v33  ;;  %v353_v62 = vadd.f32 %v2108_v7, %v342_v42 }
  0x89   : > { %v1065_v13 = vsel %vm1061_vm7, %v1053_v31, 0.0  ;;  %v354_v12 = vadd.f32 %v2109_v51, %v346_v22  ;;  %v1948_v30 = vmul.f32 %v2112_v17, %v276_v49  ;;  %v1951_v23 = vmul.f32 %v2113_v25, %v276_v49 }
  0x8a   : > { %v1056_v11 = vsel %vm1044_vm5, %v1054_v24, %v1055_v14  ;;  %v1066_v8 = vadd.f32 %v1065_v13, %v1064_v27  ;;  %v1954_v1 = vmul.f32 %v2110_v45, %v277_v9  ;;  %v1957_v52 = vmul.f32 %v2111_v63, %v277_v9  ;;  %v1974_v13 = vld [vmem:[%s1486_s20 + $0x20] sm:$0xff]  ;;  %v1980_v63 = vld [vmem:[%s1486_s20 + $0x28] sm:$0xff] }
  0x8b   : > { %v1067_v15 = vsel %vm1061_vm7, %v1056_v11, 0.0  ;;  %v1960_v2 = vmul.f32 %v2112_v17, %v278_v20  ;;  %v1963_v54 = vmul.f32 %v2113_v25, %v278_v20  ;;  %v371_v21 = vmul.f32 0.5, %v1935_v55 }
  0x8c   : > { %v1068_v40 = vadd.f32 %v1067_v15, %v1066_v8  ;;  %v372_v47 = vmul.f32 0.5, %v1944_v57  ;;  %v373_v49 = vmul.f32 0.5, %v1948_v30  ;;  %v374_v60 = vmul.f32 0.5, %v1951_v23 }
  0x8d   : > { %v395_v6 = vmul.f32 0.5, %v1954_v1  ;;  %v396_v9 = vmul.f32 0.5, %v1957_v52  ;;  %v397_v37 = vmul.f32 0.5, %v1960_v2  ;;  %v398_v43 = vmul.f32 0.5, %v1963_v54 }
  0x8e   : > { %1069 = vadd.xlane.f32.xlu1 %v1068_v40  ;;  %v379_v19 = vrot.slane %v371_v21, 2  ;;  %v380_v20 = vrot.slane %v372_v47, 2  ;;  %v381_v53 = vrot.slane %v373_v49, 2  ;;  %v382_v39 = vrot.slane %v374_v60, 2 }
  0x8f   : > { %v403_v48 = vrot.slane %v395_v6, 2  ;;  %v404_v18 = vrot.slane %v396_v9, 2  ;;  %v405_v32 = vrot.slane %v397_v37, 2  ;;  %v406_v10 = vrot.slane %v398_v43, 2 }
  0x90   : > { %v387_v4 = vsub.f32 %v325_v3, %v379_v19  ;;  %v388_v24 = vsub.f32 %v326_v46, %v380_v20  ;;  %v389_v36 = vsub.f32 %v327_v41, %v381_v53  ;;  %v390_v29 = vsub.f32 %v328_v44, %v382_v39 }
  0x91   : > { %v391_v35 = vadd.f32 %v379_v19, %v325_v3  ;;  %v392_v58 = vadd.f32 %v380_v20, %v326_v46  ;;  %v393_v27 = vadd.f32 %v381_v53, %v327_v41  ;;  %v394_v7 = vadd.f32 %v382_v39, %v328_v44 }
  0x92   : > { %v411_v51 = vsub.f32 %v351_v50, %v403_v48  ;;  %v412_v26 = vsub.f32 %v352_v0, %v404_v18  ;;  %v413_v33 = vsub.f32 %v353_v62, %v405_v32  ;;  %v414_v42 = vsub.f32 %v354_v12, %v406_v10 }
  0x93   : > { %v415_v31 = vadd.f32 %v403_v48, %v351_v50  ;;  %v416_v14 = vadd.f32 %v404_v18, %v352_v0  ;;  %v417_v22 = vadd.f32 %v405_v32, %v353_v62  ;;  %v418_v45 = vadd.f32 %v406_v10, %v354_v12 }
  0x94   : > { %v2114_v11 = vrot.slane %v1741_v28, 2  ;;  %v2115_v3 = vrot.slane %v1744_v16, 2  ;;  %v447_v41 = vrot.slane %v1776_v61, 2  ;;  %v448_v44 = vrot.slane %v1779_v56, 2 }
  0x95   : > { %v463_v50 = vrot.slane %v1758_v59, 2  ;;  %v464_v0 = vrot.slane %v1761_v38, 2  ;;  %v465_v62 = vrot.slane %v1766_v34, 2  ;;  %v466_v28 = vrot.slane %v1771_v5, 2 }
  0x96   : > { %v441_v8 = vadd.f32 %v1974_v13, %v2114_v11  ;;  %v442_v46 = vadd.f32 %v1980_v63, %v2115_v3  ;;  %v455_v17 = vmin.f32 %v391_v35, %v447_v41  ;;  %v456_v25 = vmin.f32 %v392_v58, %v448_v44  ;;  %v1361_v11 = vld [vmem:[%s1486_s20] sm:$0xff]  ;;  %v1362_v3 = vld [vmem:[%s1486_s20 + $0x8] sm:$0xff] }
  0x97   : > { %v471_v40 = vmax.f32 %v387_v4, %v463_v50  ;;  %v472_v16 = vmax.f32 %v388_v24, %v464_v0  ;;  %v473_v21 = vmax.f32 %v389_v36, %v465_v62  ;;  %v474_v47 = vmax.f32 %v390_v29, %v466_v28 }
  0x98   : > { %v449_v12 = vrot.slane %v441_v8, 2  ;;  %v450_v15 = vrot.slane %v442_v46, 2  ;;  %v483_v60 = vmin.f32 %v415_v31, %v447_v41  ;;  %v484_v56 = vmin.f32 %v416_v14, %v448_v44 }
  0x99   : > { %v475_v6 = vsub.f32 %v455_v17, %v471_v40  ;;  %v476_v59 = vsub.f32 %v456_v25, %v472_v16  ;;  %v487_v43 = vmax.f32 %v411_v51, %v463_v50  ;;  %v488_v5 = vmax.f32 %v412_v26, %v464_v0 }
  0x9a   : > { %v457_v49 = vmin.f32 %v393_v27, %v449_v12  ;;  %v458_v61 = vmin.f32 %v394_v7, %v450_v15  ;;  %v485_v9 = vmin.f32 %v417_v22, %v449_v12  ;;  %v486_v38 = vmin.f32 %v418_v45, %v450_v15 }
  0x9b   : > { %v479_v19 = vmax.f32 %v475_v6, 0.0  ;;  %v480_v20 = vmax.f32 %v476_v59, 0.0  ;;  %v489_v53 = vmax.f32 %v413_v33, %v465_v62  ;;  %v490_v39 = vmax.f32 %v414_v42, %v466_v28 }
  0x9c   : > { %v477_v37 = vsub.f32 %v457_v49, %v473_v21  ;;  %v478_v34 = vsub.f32 %v458_v61, %v474_v47  ;;  %v491_v32 = vsub.f32 %v483_v60, %v487_v43  ;;  %v492_v10 = vsub.f32 %v484_v56, %v488_v5 }
  0x9d   : > { %v493_v4 = vsub.f32 %v485_v9, %v489_v53  ;;  %v494_v24 = vsub.f32 %v486_v38, %v490_v39  ;;  %v519_v36 = vrot.slane %v1954_v1, 1  ;;  %v520_v29 = vrot.slane %v1957_v52, 1 }
  0x9e   : > { %v481_v48 = vmax.f32 %v477_v37, 0.0  ;;  %v482_v18 = vmax.f32 %v478_v34, 0.0  ;;  %v495_v35 = vmax.f32 %v491_v32, 0.0  ;;  %v496_v58 = vmax.f32 %v492_v10, 0.0 }
  0x9f   : > { %v521_v27 = vrot.slane %v1960_v2, 1  ;;  %v522_v7 = vrot.slane %v1963_v54, 1  ;;  %v497_v51 = vmax.f32 %v493_v4, 0.0  ;;  %v498_v26 = vmax.f32 %v494_v24, 0.0 }
  0xa0   : > { %v527_v33 = vmul.f32 %v519_v36, %v1935_v55  ;;  %v528_v42 = vmul.f32 %v520_v29, %v1944_v57  ;;  %v503_v31 = vrot.slane %v495_v35, 1  ;;  %v504_v14 = vrot.slane %v496_v58, 1 }
  0xa1   : > { %v529_v1 = vmul.f32 %v521_v27, %v1948_v30  ;;  %v530_v22 = vmul.f32 %v522_v7, %v1951_v23  ;;  %v505_v52 = vrot.slane %v497_v51, 1  ;;  %v506_v45 = vrot.slane %v498_v26, 1 }
  0xa2   : > { %v535_v8 = vrot.slane %v1361_v11, 1  ;;  %v536_v2 = vrot.slane %v1362_v3, 1  ;;  %v511_v46 = vmul.f32 %v503_v31, %v479_v19  ;;  %v512_v54 = vmul.f32 %v504_v14, %v480_v20 }
  0xa3   : > { %v537_v41 = vrot.slane %v1974_v13, 1  ;;  %v538_v55 = vrot.slane %v1980_v63, 1  ;;  %v513_v44 = vmul.f32 %v505_v52, %v481_v48  ;;  %v514_v57 = vmul.f32 %v506_v45, %v482_v18 }
  0xa4   : > { %v543_v50 = vmul.f32 %v1361_v11, %v535_v8  ;;  %v544_v0 = vmul.f32 %v1362_v3, %v536_v2  ;;  %v567_v12 = vrot.slane %v511_v46, 6  ;;  %v568_v15 = vrot.slane %v512_v54, 6 }
  0xa5   : > { %v545_v30 = vmul.f32 %v1974_v13, %v537_v41  ;;  %v546_v23 = vmul.f32 %v1980_v63, %v538_v55  ;;  %v569_v40 = vrot.slane %v513_v44, 6  ;;  %v570_v16 = vrot.slane %v514_v57, 6 }
  0xa6   : > { %v551_v62 = vrot.slane %v543_v50, 2  ;;  %v552_v28 = vrot.slane %v544_v0, 2  ;;  %v1078_v35 = vsel %vm611_vm0, %v1361_v11, 0.0  ;;  %v1079_v58 = vsel %vm611_vm0, %v1362_v3, 0.0 }
  0xa7   : > { %v553_v17 = vrot.slane %v545_v30, 2  ;;  %v554_v25 = vrot.slane %v546_v23, 2  ;;  %v1080_v31 = vadd.f32 %v1079_v58, %v1078_v35  ;;  %v1083_v2 = vsel %vm611_vm0, %v1980_v63, 0.0 }
  0xa8   : > { %v559_v21 = vadd.f32 %v551_v62, %v527_v33  ;;  %v560_v47 = vadd.f32 %v552_v28, %v528_v42 }
  0xa9   : > { %v561_v49 = vadd.f32 %v553_v17, %v529_v1  ;;  %v562_v61 = vadd.f32 %v554_v25, %v530_v22  ;;  %v1081_v22 = vsel %vm611_vm0, %v1974_v13, 0.0 }
  0xaa   : > { %v575_v60 = vsub.f32 %v559_v21, %v567_v12  ;;  %v576_v56 = vsub.f32 %v560_v47, %v568_v15 }
  0xab   : > { %v577_v6 = vsub.f32 %v561_v49, %v569_v40  ;;  %v578_v59 = vsub.f32 %v562_v61, %v570_v16 }
  0xac   : > { %v579_v9 = vadd.f32 1e-16, %v575_v60  ;;  %v580_v38 = vadd.f32 1e-16, %v576_v56 }
  0xad   : > { %v581_v37 = vadd.f32 1e-16, %v577_v6  ;;  %v582_v34 = vadd.f32 1e-16, %v578_v59 }
  0xae   : > { %v587_v43 = vrot.slane %v579_v9, 2  ;;  %v588_v5 = vrot.slane %v580_v38, 2 }
  0xaf   : > { %v589_v19 = vrot.slane %v581_v37, 2  ;;  %v590_v20 = vrot.slane %v582_v34, 2 }
  0xb0   : > { %1351 = vrcp.f32 %v587_v43 }
  0xb1   : > { %1353 = vrcp.f32 %v588_v5 }
  0xb2   : > { %1355 = vrcp.f32 %v589_v19 }
  0xb3   : > { %1357 = vrcp.f32 %v590_v20 }
  0xbd   : > { %v1352_v53 = vpop.eup %1351 }
  0xbe   : > { %v1354_v39 = vpop.eup %1353  ;;  %v596_v48 = vmul.f32 %v1352_v53, %v511_v46 }
  0xbf   : > { %v1356_v18 = vpop.eup %1355  ;;  %v598_v32 = vmul.f32 %v1354_v39, %v512_v54 }
  0xc0   : > { %v1358_v10 = vpop.eup %1357  ;;  %v600_v4 = vmul.f32 %v1356_v18, %v513_v44  ;;  %v603_v24 = vsub.f32 1.0, %v596_v48 }
  0xc1   : > { %v602_v36 = vmul.f32 %v1358_v10, %v514_v57  ;;  %v604_v29 = vsub.f32 1.0, %v598_v32 }
  0xc2   : > { %v605_v27 = vsub.f32 1.0, %v600_v4  ;;  %v607_v7 = vmul.f32 %v1361_v11, %v603_v24 }
  0xc3   : > { %v606_v51 = vsub.f32 1.0, %v602_v36  ;;  %v608_v26 = vmul.f32 %v1362_v3, %v604_v29  ;;  %v1082_v3 = vadd.f32 %v1081_v22, %v1080_v31 }
  0xc4   : > { %v609_v33 = vmul.f32 %v1974_v13, %v605_v27  ;;  %v612_v42 = vsel %vm611_vm0, %v607_v7, 0.0 }
  0xc5   : > { %v610_v14 = vmul.f32 %v1980_v63, %v606_v51  ;;  %v613_v1 = vsel %vm611_vm0, %v608_v26, 0.0  ;;  %v1084_v54 = vadd.f32 %v1083_v2, %v1082_v3 }
  0xc6   : > { %v614_v52 = vadd.f32 %v613_v1, %v612_v42  ;;  %v615_v45 = vsel %vm611_vm0, %v609_v33, 0.0 }
  0xc7   : > { %v617_v11 = vsel %vm611_vm0, %v610_v14, 0.0 }
  0xc8   : > { %v616_v8 = vadd.f32 %v615_v45, %v614_v52 }
  0xca   : > { %v618_v46 = vadd.f32 %v617_v11, %v616_v8 }
  0xcc   : > { %619 = vadd.xlane.f32.xlu0 %v618_v46 }
  0xd0   : > { %1085 = vadd.xlane.f32.xlu0 %v1084_v54 }
  0xd9   : > { %v716_v41 = vpop.xlane.xlu0 %715 }
  0xda   : > { %v717_v44 = vrot.slane %v716_v41, 4 }
  0xdc   : > { %v718_v0 = vadd.f32 %v717_v44, %v716_v41 }
  0xde   : > { %v719_v23 = vrot.slane %v718_v0, 2 }
  0xe0   : > { %v720_v40 = vadd.f32 %v719_v23, %v718_v0 }
  0xe2   : > { %v721_v56 = vrot.slane %v720_v40, 1 }
  0xe4   : > { %v722_v43 = vadd.f32 %v721_v56, %v720_v40 }
  0xe5   : > { %v824_v13 = vpop.xlane.xlu1 %823 }
  0xe6   : > { %v825_v57 = vrot.slane %v824_v13, 4 }
  0xe8   : > { %v826_v30 = vadd.f32 %v825_v57, %v824_v13 }
  0xea   : > { %v827_v28 = vrot.slane %v826_v30, 2 }
  0xec   : > { %v828_v47 = vadd.f32 %v827_v28, %v826_v30 }
  0xee   : > { %v829_v9 = vrot.slane %v828_v47, 1 }
  0xf0   : > { %v830_v5 = vadd.f32 %v829_v9, %v828_v47 }
 0x117   : > { %v1070_v55 = vpop.xlane.xlu1 %1069 }
 0x118   : > { %v1071_v50 = vrot.slane %v1070_v55, 4 }
 0x11a   : > { %v1072_v63 = vadd.f32 %v1071_v50, %v1070_v55 }
 0x11c   : > { %v1073_v15 = vrot.slane %v1072_v63, 2 }
 0x11e   : > { %v1074_v49 = vadd.f32 %v1073_v15, %v1072_v63 }
 0x120   : > { %v1075_v38 = vrot.slane %v1074_v49, 1 }
 0x122   : > { %v1076_v20 = vadd.f32 %v1075_v38, %v1074_v49 }
 0x155   : > { %v620_v62 = vpop.xlane.xlu0 %619 }
 0x156   : > { %v621_v12 = vrot.slane %v620_v62, 4 }
 0x158   : > { %v622_v17 = vadd.f32 %v621_v12, %v620_v62 }
 0x159   : > { %v1086_v25 = vpop.xlane.xlu0 %1085 }
 0x15a   : > { %v623_v16 = vrot.slane %v622_v17, 2  ;;  %v1087_v21 = vrot.slane %v1086_v25, 4 }
 0x15c   : > { %v1088_v61 = vadd.f32 %v1087_v21, %v1086_v25  ;;  %v624_v60 = vadd.f32 %v623_v16, %v622_v17 }
 0x15e   : > { %v1089_v6 = vrot.slane %v1088_v61, 2  ;;  %v625_v59 = vrot.slane %v624_v60, 1 }
 0x160   : > { %v1090_v37 = vadd.f32 %v1089_v6, %v1088_v61  ;;  %v626_v34 = vadd.f32 %v625_v59, %v624_v60 }
 0x162   : > { %1226 = vpush %v626_v34  ;;  %v1091_v19 = vrot.slane %v1090_v37, 1 }
 0x163   : > { %1228 = vpush %v722_v43 }
 0x164   : > { %1230 = vpush %v830_v5  ;;  %v1092_v53 = vadd.f32 %v1091_v19, %v1090_v37 }
 0x165   : > { %1232 = vpush %v1076_v20 }
 0x166   : > { %1234 = vpush %v1092_v53 }
 0x193   : > { %s1227_s26 = spop %1226 }
 0x194   : > { %s1095_s28 = sadd.f32 %s1227_s26, %s1094_s22  ;;  %s1229_s29 = spop %1228 }
 0x195   : > { %s1099_s30 = sadd.f32 %s1229_s29, %s1211_s23  ;;  %s1231_s3 = spop %1230 }
 0x196   : > { %1097 = sst [smem:[#allocation2]] %s1095_s28  ;;  %s1233_s4 = spop %1232 }
 0x197   : > { %1101 = sst [smem:[#allocation2 + $0x1]] %s1099_s30  ;;  %s1235_s7 = spop %1234 }
 0x198   : > { %s1103_s5 = sadd.f32 %s1231_s3, %s1212_s24 }
 0x199   : > { %s1107_s6 = sadd.f32 %s1233_s4, %s1213_s25 }
 0x19a   : > { %1105 = sst [smem:[#allocation2 + $0x2]] %s1103_s5  ;;  %1117 = sbr.rel (%p1215_p5) target bundleno = 493 (0x1ed), region = 36 }
 0x19b   : > { %1109 = sst [smem:[#allocation2 + $0x3]] %s1107_s6 }
 0x19c   : > { %s1111_s8 = sadd.f32 %s1235_s7, %s1214_s27 }
 0x19d   : > { %s1118_s12 = sld [smem:[#allocation2]] (!%p1215_p5) }
 0x19e   : > { %1113 = sst [smem:[#allocation2 + $0x4]] %s1111_s8 }
 0x19f   : > { %s1219_s11 = sld [smem:[#allocation2 + $0x4]] }
 0x1a0   : > { %s1216_s13 = sld [smem:[#allocation2 + $0x1]] }
 0x1a1   : > { %s1217_s14 = sld [smem:[#allocation2 + $0x2]] }
 0x1a2   : > { %s1218_s19 = sld [smem:[#allocation2 + $0x3]] }
 0x1a3   : > { %1137 = sst [smem:[#allocation3 + $0x1]] %s1118_s12  ;;  %s1131_s20 = smul.f32 0.5, %s1118_s12 }
 0x1a5   : > { %s1126_s15 = smul.f32 4.0, %s1219_s11 }
 0x1a7   : > { %v1127_v39 = vstv %s1126_s15  ;;  %s1121_s16 = smul.f32 0.5, %s1217_s14 }
 0x1a8   : > { %1363 = vrcp.f32 %v1127_v39 }
 0x1a9   : > { %s1122_s17 = sadd.f32 %s1216_s13, %s1121_s16 }
 0x1ab   : > { %s1123_s18 = smul.f32 0.0006510417, %s1122_s17 }
 0x1ad   : > { %1139 = sst [smem:[#allocation3 + $0x2]] %s1123_s18 }
 0x1ae   : > { %s1132_s21 = sadd.f32 %s1131_s20, %s1123_s18 }
 0x1b5   : > { %v1364_v48 = vpop.eup %1363 }
 0x1b6   : > { %1236 = vpush %v1364_v48 }
 0x1e7   : > { %s1237_s22 = spop %1236 }
 0x1e8   : > { %s1130_s23 = smul.f32 %s1237_s22, %s1218_s19 }
 0x1ea   : > { %s1133_s24 = sadd.f32 %s1132_s21, %s1130_s23 }
 0x1eb   : > { %1141 = sst [smem:[#allocation3 + $0x3]] %s1130_s23 }
 0x1ec   : > { %1135 = sst [smem:[#allocation3]] %s1133_s24 }
 0x1ed PF: > { %p1249_p6 = scmp.eq.s32.totalorder %s1412_s10, 2  ;;  %s1390_s25 = smov [#allocation3]  }
 0x1ef   : > { %1245 = dma.smem_to_hbm (%p1249_p6), %s1390_s25, 16, %s2028_s2, [#allocation4]  }
 0x1f0   : > { %1380 = dma.done.wait (%p1249_p6), [#allocation4], 16  }
 0x1f1   : > { %1382 = vsyncadd (%p1249_p6), [#allocation4], 4294967280 }
 0x1f2   : > { %1155 = sfence }
 0x1f3 PF: > { %s13_s9 = sadd.s32 1, %s1385_s9  }
 0x1f4   : > { %p10_p7 = scmp.ge.s32.totalorder %s13_s9, 5  }
 0x1f6   :  { %12 = sbr.rel (!%p10_p7) target bundleno = 1 (0x1), region = 80 }
 0x1fb   :  { %1161 = vsyncpa [#allocation4], 1 }
 0x1fc   :  { %1163 = vsyncpa [#allocation4 + $0x1], 1 }

</bundles_post_ra>
